<compile_context>
chip_gen: v6e
topology: v6e:2x2x1
jax: 0.10.0
libtpu: 0.0.40
codegen_flags: <defaults>
</compile_context>

<pallas_src>
import functools

import jax
import jax.numpy as jnp
from jax import lax
from jax.experimental import pallas as pl
from jax.experimental.pallas import tpu as pltpu

# ---- small, module-consistent shapes -------------------------------------
T = 8            # sequence length
D_BASE = 16      # raw input_dim (before concat of previous-label one-hot)
C = 8            # tagset_size = len(y_codebook) (includes '__START__')
H = 32           # hidden_dim  (4H = 128 -> one lane-dense gate vector)
START_IDX = 0    # y_codebook['__START__']

GW = 4 * H                 # 128 : width of the LSTM gate vector
B_ROW = D_BASE + C         # 24  : row of (b_ih + b_hh) in the param slab
BTAG_ROW = B_ROW + 1       # 25  : row of the tag bias in the param slab
SLAB_W = 3 * GW            # 384 : param-slab lane width (128 + 256)
OUT_W = 128                # lane-dense output width


# ---------------------------- Pallas kernel --------------------------------
def rnnss_kernel(x_ref, p_ref, out_ref):
    n_t = x_ref.shape[0]
    n_h = H
    gw = GW
    n_c = C

    # ---- unpack the single parameter slab (static ref slices) -------------
    wx = p_ref[0:D_BASE, 0:gw]                       # (16, 128)
    wy = p_ref[D_BASE:D_BASE + n_c, 0:gw]            # (C, 128) prev-label part
    b = p_ref[B_ROW:B_ROW + 1, 0:gw]                 # (1, 128) = b_ih + b_hh
    btag = p_ref[BTAG_ROW:BTAG_ROW + 1, 0:n_c]       # (1, C)
    w_rec = p_ref[:, gw:3 * gw]                      # (32, 256) = [Whh | Wtag pad]

    # ---- hoisted iotas (JAX does not CSE broadcast_in_dim) ----------------
    lane_iota_c = lax.broadcasted_iota(jnp.int32, (1, n_c), 1)        # (1, C)
    row_iota_tc = lax.broadcasted_iota(jnp.int32, (n_t, n_c), 0)      # (T, C)
    lane_iota_tc = lax.broadcasted_iota(jnp.int32, (n_t, n_c), 1)     # (T, C)
    wy_row_iota = lax.broadcasted_iota(jnp.int32, (n_c, gw), 0)       # (C, 4H)

    # x_t contribution to all LSTM gates for every timestep: one MXU matmul,
    # off the recurrence critical path; kept as a single (8,128) vreg value.
    gates_x = (jnp.dot(x_ref[...], wx, preferred_element_type=jnp.float32)
               + b)                                                   # (T, 4H)

    def label_row(idx2d):
        # one_hot(idx) @ W_y == row `idx` of W_y -> VPU select + sublane sum
        sel = jnp.where(wy_row_iota == idx2d, wy, 0.0)                # (C, 4H)
        return jnp.sum(sel, axis=0, keepdims=True)                    # (1, 4H)

    # init_hidden: h0 = c0 = 0  ->  gh_0 = h0 @ Whh = 0 ;
    # previous label = one-hot('__START__') -> static row of W_y.
    c = jnp.zeros((1, n_h), jnp.float32)
    gh = jnp.zeros((1, gw), jnp.float32)
    gy = wy[START_IDX:START_IDX + 1, :]                               # (1, 4H)
    logits_acc = jnp.zeros((n_t, n_c), jnp.float32)

    # Fully unrolled recurrence (trace-time Python loop, concrete t).
    for t in range(n_t):
        gx = gates_x[t:t + 1, :]                                      # (1, 4H)
        g = gx + gy + gh

        # PyTorch LSTM gate order: i, f, g, o.
        # One full-width sigmoid EUP pass, then slice; tanh only where needed.
        sig = jax.nn.sigmoid(g)
        i_g = sig[:, 0:n_h]
        f_g = sig[:, n_h:2 * n_h]
        o_g = sig[:, 3 * n_h:4 * n_h]
        g_g = jnp.tanh(g[:, 2 * n_h:3 * n_h])
        c = f_g * c + i_g * g_g
        h = o_g * jnp.tanh(c)

        # single fused MXU matmul: [ gh_{t+1} | logits_t (pre-bias) ]
        fused = jnp.dot(h, w_rec, preferred_element_type=jnp.float32)  # (1,256)
        gh = fused[:, 0:gw]                                            # (1,4H)
        logits = fused[:, gw:gw + n_c] + btag                          # (1, C)

        logits_acc = jnp.where(row_iota_tc == t,
                               jnp.broadcast_to(logits, (n_t, n_c)),
                               logits_acc)

        # greedy feedback: first-max index, fully vectorized (no scalar xfer)
        m = jnp.max(logits, axis=1, keepdims=True)
        cand = jnp.where(logits == m, lane_iota_c, n_c)
        idx2d = jnp.min(cand, axis=1, keepdims=True)                   # (1, 1)
        gy = label_row(idx2d)                                          # (1,4H)

    # -------- vectorized epilogue: all T rows at once, one output buffer ----
    m_all = jnp.max(logits_acc, axis=1, keepdims=True)
    shifted = logits_acc - m_all
    e_all = jnp.exp(shifted)
    s_all = jnp.sum(e_all, axis=1, keepdims=True)
    cand_all = jnp.where(logits_acc == m_all, lane_iota_tc, n_c)
    idx_all = jnp.min(cand_all, axis=1, keepdims=True).astype(jnp.float32)

    out_ref[...] = jnp.zeros_like(out_ref)               # deterministic padding
    out_ref[:, 0:n_c] = shifted - jnp.log(s_all)         # log-probs
    out_ref[:, n_c:2 * n_c] = e_all / s_all              # probs (exact div)
    out_ref[:, 2 * n_c:2 * n_c + 1] = idx_all            # predicted indices


# ------------------------------ wrapper -------------------------------------
def rnnss_forward(seq, packed_params):
    """seq: (1, T, D_BASE) float32 (PyTorch convention); packed_params:
    (32, 384) f32 slab from pack_params(). Returns
    (tag_logprobs (T, C), tag_probs (T, C), predtag_indxs (T,) int32)."""
    x = seq[0]                                   # (T, D_BASE)
    t = x.shape[0]

    vmem = functools.partial(pl.BlockSpec, memory_space=pltpu.MemorySpace.VMEM)
    fn = pl.pallas_call(
        rnnss_kernel,
        out_shape=jax.ShapeDtypeStruct((t, OUT_W), jnp.float32),
        in_specs=[vmem(), vmem()],
        out_specs=vmem(),
    )
    out = fn(x, packed_params)
    logp = out[:, 0:C]
    prob = out[:, C:2 * C]
    idx = out[:, 2 * C].astype(jnp.int32)
    return logp, prob, idx


# -------------------------- parameter creation ------------------------------
def init_params(key):
    ks = jax.random.split(key, 6)
    s = 1.0 / float(jnp.sqrt(H))
    w_ih = jax.random.uniform(ks[0], (4 * H, D_BASE + C), jnp.float32, -s, s)
    w_hh = jax.random.uniform(ks[1], (4 * H, H), jnp.float32, -s, s)
    b_ih = jax.random.uniform(ks[2], (4 * H,), jnp.float32, -s, s)
    b_hh = jax.random.uniform(ks[3], (4 * H,), jnp.float32, -s, s)
    w_tag = jax.random.uniform(ks[4], (C, H), jnp.float32, -s, s)
    b_tag = jax.random.uniform(ks[5], (C,), jnp.float32, -s, s)

    wx = jnp.transpose(w_ih[:, :D_BASE])          # (D_BASE, 4H)
    wy = jnp.transpose(w_ih[:, D_BASE:])          # (C, 4H)  previous-label part
    whh = jnp.transpose(w_hh)                     # (H, 4H)
    b = (b_ih + b_hh)[None, :]                    # (1, 4H)
    wtag = jnp.transpose(w_tag)                   # (H, C)
    btag = b_tag[None, :]                         # (1, C)
    return wx, wy, whh, b, wtag, btag


def pack_params(params):
    """Host-side one-time packing of all parameters into a single lane-dense
    (32, 384) f32 slab (1 input DMA): lanes 0:128 hold wx/wy/b/btag by row,
    lanes 128:384 hold the fused recurrent weight w_rec = [Whh | Wtag pad]."""
    wx, wy, whh, b, wtag, btag = params
    slab = jnp.zeros((H, SLAB_W), jnp.float32)
    slab = slab.at[0:D_BASE, 0:GW].set(wx)                    # (16, 128)
    slab = slab.at[D_BASE:D_BASE + C, 0:GW].set(wy)           # (8, 128)
    slab = slab.at[B_ROW:B_ROW + 1, 0:GW].set(b)              # (1, 128)
    slab = slab.at[BTAG_ROW:BTAG_ROW + 1, 0:C].set(btag)      # (1, C)
    slab = slab.at[:, GW:2 * GW].set(whh)                     # w_rec[:, 0:128]
    slab = slab.at[:, 2 * GW:2 * GW + C].set(wtag)            # w_rec[:, 128:128+C]
    return slab


# --------------------------- pure-JAX reference -----------------------------
def rnnss_reference(seq, params):
    wx, wy, whh, b, wtag, btag = params
    x = seq[0]
    start_oh = jax.nn.one_hot(jnp.array([START_IDX]), C, dtype=jnp.float32)

    def step(carry, x_t):
        hh, cc, oh = carry
        g = x_t[None, :] @ wx + oh @ wy + hh @ whh + b
        i_g = jax.nn.sigmoid(g[:, 0:H])
        f_g = jax.nn.sigmoid(g[:, H:2 * H])
        g_g = jnp.tanh(g[:, 2 * H:3 * H])
        o_g = jax.nn.sigmoid(g[:, 3 * H:4 * H])
        cc = f_g * cc + i_g * g_g
        hh = o_g * jnp.tanh(cc)
        logits = hh @ wtag + btag
        logp = jax.nn.log_softmax(logits, axis=1)
        prob = jax.nn.softmax(logits, axis=1)
        idx = jnp.argmax(logits, axis=1)
        oh_new = jax.nn.one_hot(idx, C, dtype=jnp.float32)
        return (hh, cc, oh_new), (logp[0], prob[0], idx[0].astype(jnp.int32))

    carry0 = (jnp.zeros((1, H), jnp.float32), jnp.zeros((1, H), jnp.float32),
              start_oh)
    _, (logps, probs, idxs) = lax.scan(step, carry0, x)
    return logps, probs, idxs


# TODO(synk): curriculum_learning (torch.bernoulli scheduled sampling when
# `labels` is provided) is not implemented; only the labels=None greedy path.
# TODO(synk): batching multiple independent sequences (megacore / v7x second
# TensorCore via a parallel batch grid axis) is out of scope: the module is
# strictly batch=1.

if __name__ == "__main__":
    key = jax.random.PRNGKey(0)
    kp, kx = jax.random.split(key)
    params = init_params(kp)
    packed = pack_params(params)
    seq = jax.random.normal(kx, (1, T, D_BASE), jnp.float32)

    logp, prob, idx = rnnss_forward(seq, packed)
    jax.block_until_ready((logp, prob, idx))

    r_logp, r_prob, r_idx = rnnss_reference(seq, params)
    assert bool(jnp.allclose(logp, r_logp, atol=1e-4, rtol=1e-4))
    assert bool(jnp.allclose(prob, r_prob, atol=1e-4, rtol=1e-4))
    assert bool(jnp.all(idx == r_idx))

    print("KERNEL_OK")
</pallas_src>

<mosaic_0001>
module attributes {stable_mosaic.version = 11 : i64} {
  func.func @rnnss_kernel(%arg0: memref<8x16xf32, #tpu.memory_space<vmem>>, %arg1: memref<32x384xf32, #tpu.memory_space<vmem>>, %arg2: memref<8x128xf32, #tpu.memory_space<vmem>>) attributes {dimension_semantics = [], scalar_prefetch = 0 : i64, scratch_operands = 0 : i64, tpu.core_type = #tpu.core_type<tc>} {
    %c0 = arith.constant 0 : index
    %c0_0 = arith.constant 0 : index
    %0 = vector.load %arg1[%c0, %c0_0] : memref<32x384xf32, #tpu.memory_space<vmem>>, vector<16x128xf32>
    %c16 = arith.constant 16 : index
    %c0_1 = arith.constant 0 : index
    %1 = vector.load %arg1[%c16, %c0_1] : memref<32x384xf32, #tpu.memory_space<vmem>>, vector<8x128xf32>
    %c24 = arith.constant 24 : index
    %c0_2 = arith.constant 0 : index
    %2 = vector.load %arg1[%c24, %c0_2] : memref<32x384xf32, #tpu.memory_space<vmem>>, vector<1x128xf32>
    %c25 = arith.constant 25 : index
    %c0_3 = arith.constant 0 : index
    %3 = vector.load %arg1[%c25, %c0_3] : memref<32x384xf32, #tpu.memory_space<vmem>>, vector<1x8xf32>
    %c0_4 = arith.constant 0 : index
    %c128 = arith.constant 128 : index
    %4 = vector.load %arg1[%c0_4, %c128] : memref<32x384xf32, #tpu.memory_space<vmem>>, vector<32x256xf32>
    %5 = tpu.iota {dimensions = array<i32: 1>} : vector<1x8xi32>
    %6 = tpu.iota {dimensions = array<i32: 0>} : vector<8x8xi32>
    %7 = tpu.iota {dimensions = array<i32: 1>} : vector<8x8xi32>
    %8 = tpu.iota {dimensions = array<i32: 0>} : vector<8x128xi32>
    %c0_5 = arith.constant 0 : index
    %c0_6 = arith.constant 0 : index
    %9 = vector.load %arg0[%c0_5, %c0_6] : memref<8x16xf32, #tpu.memory_space<vmem>>, vector<8x16xf32>
    %cst = arith.constant dense<0.000000e+00> : vector<8x128xf32>
    %10 = tpu.matmul %9, %0, %cst {dimension_numbers = #tpu.dot_dimension_numbers<[1], [0], [0], [1], [0, 0, 1, 1], [], []>} : vector<8x16xf32>, vector<16x128xf32>, vector<8x128xf32> -> vector<8x128xf32>
    %11 = vector.broadcast %2 : vector<1x128xf32> to vector<8x128xf32>
    %12 = arith.addf %10, %11 : vector<8x128xf32>
    %cst_7 = arith.constant 0.000000e+00 : f32
    %13 = vector.broadcast %cst_7 : f32 to vector<1x32xf32>
    %cst_8 = arith.constant 0.000000e+00 : f32
    %14 = vector.broadcast %cst_8 : f32 to vector<1x128xf32>
    %15 = vector.extract_strided_slice %1 {offsets = [0, 0], sizes = [1, 128], strides = [1, 1]} : vector<8x128xf32> to vector<1x128xf32>
    %cst_9 = arith.constant 0.000000e+00 : f32
    %16 = vector.broadcast %cst_9 : f32 to vector<8x8xf32>
    %17 = vector.extract_strided_slice %12 {offsets = [0, 0], sizes = [1, 128], strides = [1, 1]} : vector<8x128xf32> to vector<1x128xf32>
    %18 = arith.addf %17, %15 : vector<1x128xf32>
    %19 = arith.addf %18, %14 : vector<1x128xf32>
    %20 = arith.negf %19 : vector<1x128xf32>
    %21 = math.exp %20 : vector<1x128xf32>
    %cst_10 = arith.constant 1.000000e+00 : f32
    %22 = vector.broadcast %cst_10 : f32 to vector<1x128xf32>
    %23 = arith.addf %22, %21 : vector<1x128xf32>
    %24 = arith.divf %22, %23 : vector<1x128xf32>
    %25 = vector.extract_strided_slice %24 {offsets = [0, 0], sizes = [1, 32], strides = [1, 1]} : vector<1x128xf32> to vector<1x32xf32>
    %26 = vector.extract_strided_slice %24 {offsets = [0, 32], sizes = [1, 32], strides = [1, 1]} : vector<1x128xf32> to vector<1x32xf32>
    %27 = vector.extract_strided_slice %24 {offsets = [0, 96], sizes = [1, 32], strides = [1, 1]} : vector<1x128xf32> to vector<1x32xf32>
    %28 = vector.extract_strided_slice %19 {offsets = [0, 64], sizes = [1, 32], strides = [1, 1]} : vector<1x128xf32> to vector<1x32xf32>
    %29 = math.tanh %28 : vector<1x32xf32>
    %30 = arith.mulf %26, %13 : vector<1x32xf32>
    %31 = arith.mulf %25, %29 : vector<1x32xf32>
    %32 = arith.addf %30, %31 : vector<1x32xf32>
    %33 = math.tanh %32 : vector<1x32xf32>
    %34 = arith.mulf %27, %33 : vector<1x32xf32>
    %cst_11 = arith.constant dense<0.000000e+00> : vector<1x256xf32>
    %35 = tpu.matmul %34, %4, %cst_11 {dimension_numbers = #tpu.dot_dimension_numbers<[1], [0], [0], [1], [0, 0, 1, 1], [], []>} : vector<1x32xf32>, vector<32x256xf32>, vector<1x256xf32> -> vector<1x256xf32>
    %36 = vector.extract_strided_slice %35 {offsets = [0, 0], sizes = [1, 128], strides = [1, 1]} : vector<1x256xf32> to vector<1x128xf32>
    %37 = vector.extract_strided_slice %35 {offsets = [0, 128], sizes = [1, 8], strides = [1, 1]} : vector<1x256xf32> to vector<1x8xf32>
    %38 = arith.addf %37, %3 : vector<1x8xf32>
    %c0_i32 = arith.constant 0 : i32
    %39 = vector.broadcast %c0_i32 : i32 to vector<8x8xi32>
    %40 = arith.cmpi eq, %6, %39 : vector<8x8xi32>
    %41 = vector.shape_cast %38 : vector<1x8xf32> to vector<1x8xf32>
    %42 = vector.broadcast %41 : vector<1x8xf32> to vector<8x8xf32>
    %43 = arith.select %40, %42, %16 : vector<8x8xi1>, vector<8x8xf32>
    %cst_12 = arith.constant dense<0xFF800000> : vector<1xf32>
    %44 = vector.multi_reduction <maximumf>, %38, %cst_12 [1] : vector<1x8xf32> to vector<1xf32>
    %45 = vector.shape_cast %44 : vector<1xf32> to vector<1x1xf32>
    %46 = vector.broadcast %45 : vector<1x1xf32> to vector<1x8xf32>
    %47 = arith.cmpf oeq, %38, %46 : vector<1x8xf32>
    %c8_i32 = arith.constant 8 : i32
    %48 = vector.broadcast %c8_i32 : i32 to vector<1x8xi32>
    %49 = arith.select %47, %5, %48 : vector<1x8xi1>, vector<1x8xi32>
    %cst_13 = arith.constant dense<2147483647> : vector<1xi32>
    %50 = vector.multi_reduction <minsi>, %49, %cst_13 [1] : vector<1x8xi32> to vector<1xi32>
    %51 = vector.shape_cast %50 : vector<1xi32> to vector<1x1xi32>
    %52 = vector.broadcast %51 : vector<1x1xi32> to vector<8x128xi32>
    %53 = arith.cmpi eq, %8, %52 : vector<8x128xi32>
    %cst_14 = arith.constant 0.000000e+00 : f32
    %54 = vector.broadcast %cst_14 : f32 to vector<8x128xf32>
    %55 = arith.select %53, %1, %54 : vector<8x128xi1>, vector<8x128xf32>
    %cst_15 = arith.constant dense<0.000000e+00> : vector<128xf32>
    %56 = vector.multi_reduction <add>, %55, %cst_15 [0] : vector<8x128xf32> to vector<128xf32>
    %57 = vector.shape_cast %56 : vector<128xf32> to vector<1x128xf32>
    %58 = vector.extract_strided_slice %12 {offsets = [1, 0], sizes = [1, 128], strides = [1, 1]} : vector<8x128xf32> to vector<1x128xf32>
    %59 = arith.addf %58, %57 : vector<1x128xf32>
    %60 = arith.addf %59, %36 : vector<1x128xf32>
    %61 = arith.negf %60 : vector<1x128xf32>
    %62 = math.exp %61 : vector<1x128xf32>
    %cst_16 = arith.constant 1.000000e+00 : f32
    %63 = vector.broadcast %cst_16 : f32 to vector<1x128xf32>
    %64 = arith.addf %63, %62 : vector<1x128xf32>
    %65 = arith.divf %63, %64 : vector<1x128xf32>
    %66 = vector.extract_strided_slice %65 {offsets = [0, 0], sizes = [1, 32], strides = [1, 1]} : vector<1x128xf32> to vector<1x32xf32>
    %67 = vector.extract_strided_slice %65 {offsets = [0, 32], sizes = [1, 32], strides = [1, 1]} : vector<1x128xf32> to vector<1x32xf32>
    %68 = vector.extract_strided_slice %65 {offsets = [0, 96], sizes = [1, 32], strides = [1, 1]} : vector<1x128xf32> to vector<1x32xf32>
    %69 = vector.extract_strided_slice %60 {offsets = [0, 64], sizes = [1, 32], strides = [1, 1]} : vector<1x128xf32> to vector<1x32xf32>
    %70 = math.tanh %69 : vector<1x32xf32>
    %71 = arith.mulf %67, %32 : vector<1x32xf32>
    %72 = arith.mulf %66, %70 : vector<1x32xf32>
    %73 = arith.addf %71, %72 : vector<1x32xf32>
    %74 = math.tanh %73 : vector<1x32xf32>
    %75 = arith.mulf %68, %74 : vector<1x32xf32>
    %cst_17 = arith.constant dense<0.000000e+00> : vector<1x256xf32>
    %76 = tpu.matmul %75, %4, %cst_17 {dimension_numbers = #tpu.dot_dimension_numbers<[1], [0], [0], [1], [0, 0, 1, 1], [], []>} : vector<1x32xf32>, vector<32x256xf32>, vector<1x256xf32> -> vector<1x256xf32>
    %77 = vector.extract_strided_slice %76 {offsets = [0, 0], sizes = [1, 128], strides = [1, 1]} : vector<1x256xf32> to vector<1x128xf32>
    %78 = vector.extract_strided_slice %76 {offsets = [0, 128], sizes = [1, 8], strides = [1, 1]} : vector<1x256xf32> to vector<1x8xf32>
    %79 = arith.addf %78, %3 : vector<1x8xf32>
    %c1_i32 = arith.constant 1 : i32
    %80 = vector.broadcast %c1_i32 : i32 to vector<8x8xi32>
    %81 = arith.cmpi eq, %6, %80 : vector<8x8xi32>
    %82 = vector.shape_cast %79 : vector<1x8xf32> to vector<1x8xf32>
    %83 = vector.broadcast %82 : vector<1x8xf32> to vector<8x8xf32>
    %84 = arith.select %81, %83, %43 : vector<8x8xi1>, vector<8x8xf32>
    %cst_18 = arith.constant dense<0xFF800000> : vector<1xf32>
    %85 = vector.multi_reduction <maximumf>, %79, %cst_18 [1] : vector<1x8xf32> to vector<1xf32>
    %86 = vector.shape_cast %85 : vector<1xf32> to vector<1x1xf32>
    %87 = vector.broadcast %86 : vector<1x1xf32> to vector<1x8xf32>
    %88 = arith.cmpf oeq, %79, %87 : vector<1x8xf32>
    %c8_i32_19 = arith.constant 8 : i32
    %89 = vector.broadcast %c8_i32_19 : i32 to vector<1x8xi32>
    %90 = arith.select %88, %5, %89 : vector<1x8xi1>, vector<1x8xi32>
    %cst_20 = arith.constant dense<2147483647> : vector<1xi32>
    %91 = vector.multi_reduction <minsi>, %90, %cst_20 [1] : vector<1x8xi32> to vector<1xi32>
    %92 = vector.shape_cast %91 : vector<1xi32> to vector<1x1xi32>
    %93 = vector.broadcast %92 : vector<1x1xi32> to vector<8x128xi32>
    %94 = arith.cmpi eq, %8, %93 : vector<8x128xi32>
    %cst_21 = arith.constant 0.000000e+00 : f32
    %95 = vector.broadcast %cst_21 : f32 to vector<8x128xf32>
    %96 = arith.select %94, %1, %95 : vector<8x128xi1>, vector<8x128xf32>
    %cst_22 = arith.constant dense<0.000000e+00> : vector<128xf32>
    %97 = vector.multi_reduction <add>, %96, %cst_22 [0] : vector<8x128xf32> to vector<128xf32>
    %98 = vector.shape_cast %97 : vector<128xf32> to vector<1x128xf32>
    %99 = vector.extract_strided_slice %12 {offsets = [2, 0], sizes = [1, 128], strides = [1, 1]} : vector<8x128xf32> to vector<1x128xf32>
    %100 = arith.addf %99, %98 : vector<1x128xf32>
    %101 = arith.addf %100, %77 : vector<1x128xf32>
    %102 = arith.negf %101 : vector<1x128xf32>
    %103 = math.exp %102 : vector<1x128xf32>
    %cst_23 = arith.constant 1.000000e+00 : f32
    %104 = vector.broadcast %cst_23 : f32 to vector<1x128xf32>
    %105 = arith.addf %104, %103 : vector<1x128xf32>
    %106 = arith.divf %104, %105 : vector<1x128xf32>
    %107 = vector.extract_strided_slice %106 {offsets = [0, 0], sizes = [1, 32], strides = [1, 1]} : vector<1x128xf32> to vector<1x32xf32>
    %108 = vector.extract_strided_slice %106 {offsets = [0, 32], sizes = [1, 32], strides = [1, 1]} : vector<1x128xf32> to vector<1x32xf32>
    %109 = vector.extract_strided_slice %106 {offsets = [0, 96], sizes = [1, 32], strides = [1, 1]} : vector<1x128xf32> to vector<1x32xf32>
    %110 = vector.extract_strided_slice %101 {offsets = [0, 64], sizes = [1, 32], strides = [1, 1]} : vector<1x128xf32> to vector<1x32xf32>
    %111 = math.tanh %110 : vector<1x32xf32>
    %112 = arith.mulf %108, %73 : vector<1x32xf32>
    %113 = arith.mulf %107, %111 : vector<1x32xf32>
    %114 = arith.addf %112, %113 : vector<1x32xf32>
    %115 = math.tanh %114 : vector<1x32xf32>
    %116 = arith.mulf %109, %115 : vector<1x32xf32>
    %cst_24 = arith.constant dense<0.000000e+00> : vector<1x256xf32>
    %117 = tpu.matmul %116, %4, %cst_24 {dimension_numbers = #tpu.dot_dimension_numbers<[1], [0], [0], [1], [0, 0, 1, 1], [], []>} : vector<1x32xf32>, vector<32x256xf32>, vector<1x256xf32> -> vector<1x256xf32>
    %118 = vector.extract_strided_slice %117 {offsets = [0, 0], sizes = [1, 128], strides = [1, 1]} : vector<1x256xf32> to vector<1x128xf32>
    %119 = vector.extract_strided_slice %117 {offsets = [0, 128], sizes = [1, 8], strides = [1, 1]} : vector<1x256xf32> to vector<1x8xf32>
    %120 = arith.addf %119, %3 : vector<1x8xf32>
    %c2_i32 = arith.constant 2 : i32
    %121 = vector.broadcast %c2_i32 : i32 to vector<8x8xi32>
    %122 = arith.cmpi eq, %6, %121 : vector<8x8xi32>
    %123 = vector.shape_cast %120 : vector<1x8xf32> to vector<1x8xf32>
    %124 = vector.broadcast %123 : vector<1x8xf32> to vector<8x8xf32>
    %125 = arith.select %122, %124, %84 : vector<8x8xi1>, vector<8x8xf32>
    %cst_25 = arith.constant dense<0xFF800000> : vector<1xf32>
    %126 = vector.multi_reduction <maximumf>, %120, %cst_25 [1] : vector<1x8xf32> to vector<1xf32>
    %127 = vector.shape_cast %126 : vector<1xf32> to vector<1x1xf32>
    %128 = vector.broadcast %127 : vector<1x1xf32> to vector<1x8xf32>
    %129 = arith.cmpf oeq, %120, %128 : vector<1x8xf32>
    %c8_i32_26 = arith.constant 8 : i32
    %130 = vector.broadcast %c8_i32_26 : i32 to vector<1x8xi32>
    %131 = arith.select %129, %5, %130 : vector<1x8xi1>, vector<1x8xi32>
    %cst_27 = arith.constant dense<2147483647> : vector<1xi32>
    %132 = vector.multi_reduction <minsi>, %131, %cst_27 [1] : vector<1x8xi32> to vector<1xi32>
    %133 = vector.shape_cast %132 : vector<1xi32> to vector<1x1xi32>
    %134 = vector.broadcast %133 : vector<1x1xi32> to vector<8x128xi32>
    %135 = arith.cmpi eq, %8, %134 : vector<8x128xi32>
    %cst_28 = arith.constant 0.000000e+00 : f32
    %136 = vector.broadcast %cst_28 : f32 to vector<8x128xf32>
    %137 = arith.select %135, %1, %136 : vector<8x128xi1>, vector<8x128xf32>
    %cst_29 = arith.constant dense<0.000000e+00> : vector<128xf32>
    %138 = vector.multi_reduction <add>, %137, %cst_29 [0] : vector<8x128xf32> to vector<128xf32>
    %139 = vector.shape_cast %138 : vector<128xf32> to vector<1x128xf32>
    %140 = vector.extract_strided_slice %12 {offsets = [3, 0], sizes = [1, 128], strides = [1, 1]} : vector<8x128xf32> to vector<1x128xf32>
    %141 = arith.addf %140, %139 : vector<1x128xf32>
    %142 = arith.addf %141, %118 : vector<1x128xf32>
    %143 = arith.negf %142 : vector<1x128xf32>
    %144 = math.exp %143 : vector<1x128xf32>
    %cst_30 = arith.constant 1.000000e+00 : f32
    %145 = vector.broadcast %cst_30 : f32 to vector<1x128xf32>
    %146 = arith.addf %145, %144 : vector<1x128xf32>
    %147 = arith.divf %145, %146 : vector<1x128xf32>
    %148 = vector.extract_strided_slice %147 {offsets = [0, 0], sizes = [1, 32], strides = [1, 1]} : vector<1x128xf32> to vector<1x32xf32>
    %149 = vector.extract_strided_slice %147 {offsets = [0, 32], sizes = [1, 32], strides = [1, 1]} : vector<1x128xf32> to vector<1x32xf32>
    %150 = vector.extract_strided_slice %147 {offsets = [0, 96], sizes = [1, 32], strides = [1, 1]} : vector<1x128xf32> to vector<1x32xf32>
    %151 = vector.extract_strided_slice %142 {offsets = [0, 64], sizes = [1, 32], strides = [1, 1]} : vector<1x128xf32> to vector<1x32xf32>
    %152 = math.tanh %151 : vector<1x32xf32>
    %153 = arith.mulf %149, %114 : vector<1x32xf32>
    %154 = arith.mulf %148, %152 : vector<1x32xf32>
    %155 = arith.addf %153, %154 : vector<1x32xf32>
    %156 = math.tanh %155 : vector<1x32xf32>
    %157 = arith.mulf %150, %156 : vector<1x32xf32>
    %cst_31 = arith.constant dense<0.000000e+00> : vector<1x256xf32>
    %158 = tpu.matmul %157, %4, %cst_31 {dimension_numbers = #tpu.dot_dimension_numbers<[1], [0], [0], [1], [0, 0, 1, 1], [], []>} : vector<1x32xf32>, vector<32x256xf32>, vector<1x256xf32> -> vector<1x256xf32>
    %159 = vector.extract_strided_slice %158 {offsets = [0, 0], sizes = [1, 128], strides = [1, 1]} : vector<1x256xf32> to vector<1x128xf32>
    %160 = vector.extract_strided_slice %158 {offsets = [0, 128], sizes = [1, 8], strides = [1, 1]} : vector<1x256xf32> to vector<1x8xf32>
    %161 = arith.addf %160, %3 : vector<1x8xf32>
    %c3_i32 = arith.constant 3 : i32
    %162 = vector.broadcast %c3_i32 : i32 to vector<8x8xi32>
    %163 = arith.cmpi eq, %6, %162 : vector<8x8xi32>
    %164 = vector.shape_cast %161 : vector<1x8xf32> to vector<1x8xf32>
    %165 = vector.broadcast %164 : vector<1x8xf32> to vector<8x8xf32>
    %166 = arith.select %163, %165, %125 : vector<8x8xi1>, vector<8x8xf32>
    %cst_32 = arith.constant dense<0xFF800000> : vector<1xf32>
    %167 = vector.multi_reduction <maximumf>, %161, %cst_32 [1] : vector<1x8xf32> to vector<1xf32>
    %168 = vector.shape_cast %167 : vector<1xf32> to vector<1x1xf32>
    %169 = vector.broadcast %168 : vector<1x1xf32> to vector<1x8xf32>
    %170 = arith.cmpf oeq, %161, %169 : vector<1x8xf32>
    %c8_i32_33 = arith.constant 8 : i32
    %171 = vector.broadcast %c8_i32_33 : i32 to vector<1x8xi32>
    %172 = arith.select %170, %5, %171 : vector<1x8xi1>, vector<1x8xi32>
    %cst_34 = arith.constant dense<2147483647> : vector<1xi32>
    %173 = vector.multi_reduction <minsi>, %172, %cst_34 [1] : vector<1x8xi32> to vector<1xi32>
    %174 = vector.shape_cast %173 : vector<1xi32> to vector<1x1xi32>
    %175 = vector.broadcast %174 : vector<1x1xi32> to vector<8x128xi32>
    %176 = arith.cmpi eq, %8, %175 : vector<8x128xi32>
    %cst_35 = arith.constant 0.000000e+00 : f32
    %177 = vector.broadcast %cst_35 : f32 to vector<8x128xf32>
    %178 = arith.select %176, %1, %177 : vector<8x128xi1>, vector<8x128xf32>
    %cst_36 = arith.constant dense<0.000000e+00> : vector<128xf32>
    %179 = vector.multi_reduction <add>, %178, %cst_36 [0] : vector<8x128xf32> to vector<128xf32>
    %180 = vector.shape_cast %179 : vector<128xf32> to vector<1x128xf32>
    %181 = vector.extract_strided_slice %12 {offsets = [4, 0], sizes = [1, 128], strides = [1, 1]} : vector<8x128xf32> to vector<1x128xf32>
    %182 = arith.addf %181, %180 : vector<1x128xf32>
    %183 = arith.addf %182, %159 : vector<1x128xf32>
    %184 = arith.negf %183 : vector<1x128xf32>
    %185 = math.exp %184 : vector<1x128xf32>
    %cst_37 = arith.constant 1.000000e+00 : f32
    %186 = vector.broadcast %cst_37 : f32 to vector<1x128xf32>
    %187 = arith.addf %186, %185 : vector<1x128xf32>
    %188 = arith.divf %186, %187 : vector<1x128xf32>
    %189 = vector.extract_strided_slice %188 {offsets = [0, 0], sizes = [1, 32], strides = [1, 1]} : vector<1x128xf32> to vector<1x32xf32>
    %190 = vector.extract_strided_slice %188 {offsets = [0, 32], sizes = [1, 32], strides = [1, 1]} : vector<1x128xf32> to vector<1x32xf32>
    %191 = vector.extract_strided_slice %188 {offsets = [0, 96], sizes = [1, 32], strides = [1, 1]} : vector<1x128xf32> to vector<1x32xf32>
    %192 = vector.extract_strided_slice %183 {offsets = [0, 64], sizes = [1, 32], strides = [1, 1]} : vector<1x128xf32> to vector<1x32xf32>
    %193 = math.tanh %192 : vector<1x32xf32>
    %194 = arith.mulf %190, %155 : vector<1x32xf32>
    %195 = arith.mulf %189, %193 : vector<1x32xf32>
    %196 = arith.addf %194, %195 : vector<1x32xf32>
    %197 = math.tanh %196 : vector<1x32xf32>
    %198 = arith.mulf %191, %197 : vector<1x32xf32>
    %cst_38 = arith.constant dense<0.000000e+00> : vector<1x256xf32>
    %199 = tpu.matmul %198, %4, %cst_38 {dimension_numbers = #tpu.dot_dimension_numbers<[1], [0], [0], [1], [0, 0, 1, 1], [], []>} : vector<1x32xf32>, vector<32x256xf32>, vector<1x256xf32> -> vector<1x256xf32>
    %200 = vector.extract_strided_slice %199 {offsets = [0, 0], sizes = [1, 128], strides = [1, 1]} : vector<1x256xf32> to vector<1x128xf32>
    %201 = vector.extract_strided_slice %199 {offsets = [0, 128], sizes = [1, 8], strides = [1, 1]} : vector<1x256xf32> to vector<1x8xf32>
    %202 = arith.addf %201, %3 : vector<1x8xf32>
    %c4_i32 = arith.constant 4 : i32
    %203 = vector.broadcast %c4_i32 : i32 to vector<8x8xi32>
    %204 = arith.cmpi eq, %6, %203 : vector<8x8xi32>
    %205 = vector.shape_cast %202 : vector<1x8xf32> to vector<1x8xf32>
    %206 = vector.broadcast %205 : vector<1x8xf32> to vector<8x8xf32>
    %207 = arith.select %204, %206, %166 : vector<8x8xi1>, vector<8x8xf32>
    %cst_39 = arith.constant dense<0xFF800000> : vector<1xf32>
    %208 = vector.multi_reduction <maximumf>, %202, %cst_39 [1] : vector<1x8xf32> to vector<1xf32>
    %209 = vector.shape_cast %208 : vector<1xf32> to vector<1x1xf32>
    %210 = vector.broadcast %209 : vector<1x1xf32> to vector<1x8xf32>
    %211 = arith.cmpf oeq, %202, %210 : vector<1x8xf32>
    %c8_i32_40 = arith.constant 8 : i32
    %212 = vector.broadcast %c8_i32_40 : i32 to vector<1x8xi32>
    %213 = arith.select %211, %5, %212 : vector<1x8xi1>, vector<1x8xi32>
    %cst_41 = arith.constant dense<2147483647> : vector<1xi32>
    %214 = vector.multi_reduction <minsi>, %213, %cst_41 [1] : vector<1x8xi32> to vector<1xi32>
    %215 = vector.shape_cast %214 : vector<1xi32> to vector<1x1xi32>
    %216 = vector.broadcast %215 : vector<1x1xi32> to vector<8x128xi32>
    %217 = arith.cmpi eq, %8, %216 : vector<8x128xi32>
    %cst_42 = arith.constant 0.000000e+00 : f32
    %218 = vector.broadcast %cst_42 : f32 to vector<8x128xf32>
    %219 = arith.select %217, %1, %218 : vector<8x128xi1>, vector<8x128xf32>
    %cst_43 = arith.constant dense<0.000000e+00> : vector<128xf32>
    %220 = vector.multi_reduction <add>, %219, %cst_43 [0] : vector<8x128xf32> to vector<128xf32>
    %221 = vector.shape_cast %220 : vector<128xf32> to vector<1x128xf32>
    %222 = vector.extract_strided_slice %12 {offsets = [5, 0], sizes = [1, 128], strides = [1, 1]} : vector<8x128xf32> to vector<1x128xf32>
    %223 = arith.addf %222, %221 : vector<1x128xf32>
    %224 = arith.addf %223, %200 : vector<1x128xf32>
    %225 = arith.negf %224 : vector<1x128xf32>
    %226 = math.exp %225 : vector<1x128xf32>
    %cst_44 = arith.constant 1.000000e+00 : f32
    %227 = vector.broadcast %cst_44 : f32 to vector<1x128xf32>
    %228 = arith.addf %227, %226 : vector<1x128xf32>
    %229 = arith.divf %227, %228 : vector<1x128xf32>
    %230 = vector.extract_strided_slice %229 {offsets = [0, 0], sizes = [1, 32], strides = [1, 1]} : vector<1x128xf32> to vector<1x32xf32>
    %231 = vector.extract_strided_slice %229 {offsets = [0, 32], sizes = [1, 32], strides = [1, 1]} : vector<1x128xf32> to vector<1x32xf32>
    %232 = vector.extract_strided_slice %229 {offsets = [0, 96], sizes = [1, 32], strides = [1, 1]} : vector<1x128xf32> to vector<1x32xf32>
    %233 = vector.extract_strided_slice %224 {offsets = [0, 64], sizes = [1, 32], strides = [1, 1]} : vector<1x128xf32> to vector<1x32xf32>
    %234 = math.tanh %233 : vector<1x32xf32>
    %235 = arith.mulf %231, %196 : vector<1x32xf32>
    %236 = arith.mulf %230, %234 : vector<1x32xf32>
    %237 = arith.addf %235, %236 : vector<1x32xf32>
    %238 = math.tanh %237 : vector<1x32xf32>
    %239 = arith.mulf %232, %238 : vector<1x32xf32>
    %cst_45 = arith.constant dense<0.000000e+00> : vector<1x256xf32>
    %240 = tpu.matmul %239, %4, %cst_45 {dimension_numbers = #tpu.dot_dimension_numbers<[1], [0], [0], [1], [0, 0, 1, 1], [], []>} : vector<1x32xf32>, vector<32x256xf32>, vector<1x256xf32> -> vector<1x256xf32>
    %241 = vector.extract_strided_slice %240 {offsets = [0, 0], sizes = [1, 128], strides = [1, 1]} : vector<1x256xf32> to vector<1x128xf32>
    %242 = vector.extract_strided_slice %240 {offsets = [0, 128], sizes = [1, 8], strides = [1, 1]} : vector<1x256xf32> to vector<1x8xf32>
    %243 = arith.addf %242, %3 : vector<1x8xf32>
    %c5_i32 = arith.constant 5 : i32
    %244 = vector.broadcast %c5_i32 : i32 to vector<8x8xi32>
    %245 = arith.cmpi eq, %6, %244 : vector<8x8xi32>
    %246 = vector.shape_cast %243 : vector<1x8xf32> to vector<1x8xf32>
    %247 = vector.broadcast %246 : vector<1x8xf32> to vector<8x8xf32>
    %248 = arith.select %245, %247, %207 : vector<8x8xi1>, vector<8x8xf32>
    %cst_46 = arith.constant dense<0xFF800000> : vector<1xf32>
    %249 = vector.multi_reduction <maximumf>, %243, %cst_46 [1] : vector<1x8xf32> to vector<1xf32>
    %250 = vector.shape_cast %249 : vector<1xf32> to vector<1x1xf32>
    %251 = vector.broadcast %250 : vector<1x1xf32> to vector<1x8xf32>
    %252 = arith.cmpf oeq, %243, %251 : vector<1x8xf32>
    %c8_i32_47 = arith.constant 8 : i32
    %253 = vector.broadcast %c8_i32_47 : i32 to vector<1x8xi32>
    %254 = arith.select %252, %5, %253 : vector<1x8xi1>, vector<1x8xi32>
    %cst_48 = arith.constant dense<2147483647> : vector<1xi32>
    %255 = vector.multi_reduction <minsi>, %254, %cst_48 [1] : vector<1x8xi32> to vector<1xi32>
    %256 = vector.shape_cast %255 : vector<1xi32> to vector<1x1xi32>
    %257 = vector.broadcast %256 : vector<1x1xi32> to vector<8x128xi32>
    %258 = arith.cmpi eq, %8, %257 : vector<8x128xi32>
    %cst_49 = arith.constant 0.000000e+00 : f32
    %259 = vector.broadcast %cst_49 : f32 to vector<8x128xf32>
    %260 = arith.select %258, %1, %259 : vector<8x128xi1>, vector<8x128xf32>
    %cst_50 = arith.constant dense<0.000000e+00> : vector<128xf32>
    %261 = vector.multi_reduction <add>, %260, %cst_50 [0] : vector<8x128xf32> to vector<128xf32>
    %262 = vector.shape_cast %261 : vector<128xf32> to vector<1x128xf32>
    %263 = vector.extract_strided_slice %12 {offsets = [6, 0], sizes = [1, 128], strides = [1, 1]} : vector<8x128xf32> to vector<1x128xf32>
    %264 = arith.addf %263, %262 : vector<1x128xf32>
    %265 = arith.addf %264, %241 : vector<1x128xf32>
    %266 = arith.negf %265 : vector<1x128xf32>
    %267 = math.exp %266 : vector<1x128xf32>
    %cst_51 = arith.constant 1.000000e+00 : f32
    %268 = vector.broadcast %cst_51 : f32 to vector<1x128xf32>
    %269 = arith.addf %268, %267 : vector<1x128xf32>
    %270 = arith.divf %268, %269 : vector<1x128xf32>
    %271 = vector.extract_strided_slice %270 {offsets = [0, 0], sizes = [1, 32], strides = [1, 1]} : vector<1x128xf32> to vector<1x32xf32>
    %272 = vector.extract_strided_slice %270 {offsets = [0, 32], sizes = [1, 32], strides = [1, 1]} : vector<1x128xf32> to vector<1x32xf32>
    %273 = vector.extract_strided_slice %270 {offsets = [0, 96], sizes = [1, 32], strides = [1, 1]} : vector<1x128xf32> to vector<1x32xf32>
    %274 = vector.extract_strided_slice %265 {offsets = [0, 64], sizes = [1, 32], strides = [1, 1]} : vector<1x128xf32> to vector<1x32xf32>
    %275 = math.tanh %274 : vector<1x32xf32>
    %276 = arith.mulf %272, %237 : vector<1x32xf32>
    %277 = arith.mulf %271, %275 : vector<1x32xf32>
    %278 = arith.addf %276, %277 : vector<1x32xf32>
    %279 = math.tanh %278 : vector<1x32xf32>
    %280 = arith.mulf %273, %279 : vector<1x32xf32>
    %cst_52 = arith.constant dense<0.000000e+00> : vector<1x256xf32>
    %281 = tpu.matmul %280, %4, %cst_52 {dimension_numbers = #tpu.dot_dimension_numbers<[1], [0], [0], [1], [0, 0, 1, 1], [], []>} : vector<1x32xf32>, vector<32x256xf32>, vector<1x256xf32> -> vector<1x256xf32>
    %282 = vector.extract_strided_slice %281 {offsets = [0, 0], sizes = [1, 128], strides = [1, 1]} : vector<1x256xf32> to vector<1x128xf32>
    %283 = vector.extract_strided_slice %281 {offsets = [0, 128], sizes = [1, 8], strides = [1, 1]} : vector<1x256xf32> to vector<1x8xf32>
    %284 = arith.addf %283, %3 : vector<1x8xf32>
    %c6_i32 = arith.constant 6 : i32
    %285 = vector.broadcast %c6_i32 : i32 to vector<8x8xi32>
    %286 = arith.cmpi eq, %6, %285 : vector<8x8xi32>
    %287 = vector.shape_cast %284 : vector<1x8xf32> to vector<1x8xf32>
    %288 = vector.broadcast %287 : vector<1x8xf32> to vector<8x8xf32>
    %289 = arith.select %286, %288, %248 : vector<8x8xi1>, vector<8x8xf32>
    %cst_53 = arith.constant dense<0xFF800000> : vector<1xf32>
    %290 = vector.multi_reduction <maximumf>, %284, %cst_53 [1] : vector<1x8xf32> to vector<1xf32>
    %291 = vector.shape_cast %290 : vector<1xf32> to vector<1x1xf32>
    %292 = vector.broadcast %291 : vector<1x1xf32> to vector<1x8xf32>
    %293 = arith.cmpf oeq, %284, %292 : vector<1x8xf32>
    %c8_i32_54 = arith.constant 8 : i32
    %294 = vector.broadcast %c8_i32_54 : i32 to vector<1x8xi32>
    %295 = arith.select %293, %5, %294 : vector<1x8xi1>, vector<1x8xi32>
    %cst_55 = arith.constant dense<2147483647> : vector<1xi32>
    %296 = vector.multi_reduction <minsi>, %295, %cst_55 [1] : vector<1x8xi32> to vector<1xi32>
    %297 = vector.shape_cast %296 : vector<1xi32> to vector<1x1xi32>
    %298 = vector.broadcast %297 : vector<1x1xi32> to vector<8x128xi32>
    %299 = arith.cmpi eq, %8, %298 : vector<8x128xi32>
    %cst_56 = arith.constant 0.000000e+00 : f32
    %300 = vector.broadcast %cst_56 : f32 to vector<8x128xf32>
    %301 = arith.select %299, %1, %300 : vector<8x128xi1>, vector<8x128xf32>
    %cst_57 = arith.constant dense<0.000000e+00> : vector<128xf32>
    %302 = vector.multi_reduction <add>, %301, %cst_57 [0] : vector<8x128xf32> to vector<128xf32>
    %303 = vector.shape_cast %302 : vector<128xf32> to vector<1x128xf32>
    %304 = vector.extract_strided_slice %12 {offsets = [7, 0], sizes = [1, 128], strides = [1, 1]} : vector<8x128xf32> to vector<1x128xf32>
    %305 = arith.addf %304, %303 : vector<1x128xf32>
    %306 = arith.addf %305, %282 : vector<1x128xf32>
    %307 = arith.negf %306 : vector<1x128xf32>
    %308 = math.exp %307 : vector<1x128xf32>
    %cst_58 = arith.constant 1.000000e+00 : f32
    %309 = vector.broadcast %cst_58 : f32 to vector<1x128xf32>
    %310 = arith.addf %309, %308 : vector<1x128xf32>
    %311 = arith.divf %309, %310 : vector<1x128xf32>
    %312 = vector.extract_strided_slice %311 {offsets = [0, 0], sizes = [1, 32], strides = [1, 1]} : vector<1x128xf32> to vector<1x32xf32>
    %313 = vector.extract_strided_slice %311 {offsets = [0, 32], sizes = [1, 32], strides = [1, 1]} : vector<1x128xf32> to vector<1x32xf32>
    %314 = vector.extract_strided_slice %311 {offsets = [0, 96], sizes = [1, 32], strides = [1, 1]} : vector<1x128xf32> to vector<1x32xf32>
    %315 = vector.extract_strided_slice %306 {offsets = [0, 64], sizes = [1, 32], strides = [1, 1]} : vector<1x128xf32> to vector<1x32xf32>
    %316 = math.tanh %315 : vector<1x32xf32>
    %317 = arith.mulf %313, %278 : vector<1x32xf32>
    %318 = arith.mulf %312, %316 : vector<1x32xf32>
    %319 = arith.addf %317, %318 : vector<1x32xf32>
    %320 = math.tanh %319 : vector<1x32xf32>
    %321 = arith.mulf %314, %320 : vector<1x32xf32>
    %cst_59 = arith.constant dense<0.000000e+00> : vector<1x256xf32>
    %322 = tpu.matmul %321, %4, %cst_59 {dimension_numbers = #tpu.dot_dimension_numbers<[1], [0], [0], [1], [0, 0, 1, 1], [], []>} : vector<1x32xf32>, vector<32x256xf32>, vector<1x256xf32> -> vector<1x256xf32>
    %323 = vector.extract_strided_slice %322 {offsets = [0, 128], sizes = [1, 8], strides = [1, 1]} : vector<1x256xf32> to vector<1x8xf32>
    %324 = arith.addf %323, %3 : vector<1x8xf32>
    %c7_i32 = arith.constant 7 : i32
    %325 = vector.broadcast %c7_i32 : i32 to vector<8x8xi32>
    %326 = arith.cmpi eq, %6, %325 : vector<8x8xi32>
    %327 = vector.shape_cast %324 : vector<1x8xf32> to vector<1x8xf32>
    %328 = vector.broadcast %327 : vector<1x8xf32> to vector<8x8xf32>
    %329 = arith.select %326, %328, %289 : vector<8x8xi1>, vector<8x8xf32>
    %cst_60 = arith.constant dense<0xFF800000> : vector<8xf32>
    %330 = vector.multi_reduction <maximumf>, %329, %cst_60 [1] : vector<8x8xf32> to vector<8xf32>
    %331 = vector.shape_cast %330 : vector<8xf32> to vector<8x1xf32>
    %332 = vector.broadcast %331 : vector<8x1xf32> to vector<8x8xf32>
    %333 = arith.subf %329, %332 : vector<8x8xf32>
    %334 = math.exp %333 : vector<8x8xf32>
    %cst_61 = arith.constant dense<0.000000e+00> : vector<8xf32>
    %335 = vector.multi_reduction <add>, %334, %cst_61 [1] : vector<8x8xf32> to vector<8xf32>
    %336 = vector.shape_cast %335 : vector<8xf32> to vector<8x1xf32>
    %337 = vector.broadcast %331 : vector<8x1xf32> to vector<8x8xf32>
    %338 = arith.cmpf oeq, %329, %337 : vector<8x8xf32>
    %c8_i32_62 = arith.constant 8 : i32
    %339 = vector.broadcast %c8_i32_62 : i32 to vector<8x8xi32>
    %340 = arith.select %338, %7, %339 : vector<8x8xi1>, vector<8x8xi32>
    %cst_63 = arith.constant dense<2147483647> : vector<8xi32>
    %341 = vector.multi_reduction <minsi>, %340, %cst_63 [1] : vector<8x8xi32> to vector<8xi32>
    %342 = vector.shape_cast %341 : vector<8xi32> to vector<8x1xi32>
    %343 = arith.sitofp %342 : vector<8x1xi32> to vector<8x1xf32>
    %cst_64 = arith.constant 0.000000e+00 : f32
    %344 = vector.broadcast %cst_64 : f32 to vector<8x128xf32>
    %c0_65 = arith.constant 0 : index
    %c0_66 = arith.constant 0 : index
    %345 = vector.load %arg2[%c0_65, %c0_66] : memref<8x128xf32, #tpu.memory_space<vmem>>, vector<8x128xf32>
    tpu.vector_store %arg2[%c0_65, %c0_66], %344 {strides = array<i32>} : memref<8x128xf32, #tpu.memory_space<vmem>>, vector<8x128xf32>,
    %346 = math.log %336 : vector<8x1xf32>
    %347 = vector.broadcast %346 : vector<8x1xf32> to vector<8x8xf32>
    %348 = arith.subf %333, %347 : vector<8x8xf32>
    %c0_67 = arith.constant 0 : index
    %c0_68 = arith.constant 0 : index
    %349 = vector.load %arg2[%c0_67, %c0_68] : memref<8x128xf32, #tpu.memory_space<vmem>>, vector<8x8xf32>
    tpu.vector_store %arg2[%c0_67, %c0_68], %348 {strides = array<i32>} : memref<8x128xf32, #tpu.memory_space<vmem>>, vector<8x8xf32>,
    %350 = vector.broadcast %336 : vector<8x1xf32> to vector<8x8xf32>
    %351 = arith.divf %334, %350 : vector<8x8xf32>
    %c0_69 = arith.constant 0 : index
    %c8 = arith.constant 8 : index
    %352 = vector.load %arg2[%c0_69, %c8] : memref<8x128xf32, #tpu.memory_space<vmem>>, vector<8x8xf32>
    tpu.vector_store %arg2[%c0_69, %c8], %351 {strides = array<i32>} : memref<8x128xf32, #tpu.memory_space<vmem>>, vector<8x8xf32>,
    %c0_70 = arith.constant 0 : index
    %c16_71 = arith.constant 16 : index
    %353 = vector.load %arg2[%c0_70, %c16_71] : memref<8x128xf32, #tpu.memory_space<vmem>>, vector<8x1xf32>
    tpu.vector_store %arg2[%c0_70, %c16_71], %343 {strides = array<i32>} : memref<8x128xf32, #tpu.memory_space<vmem>>, vector<8x1xf32>,
    return
  }
}

</mosaic_0001>

<bundles_post_ra>
// kernel: tpu_custom_call.1
= control target key start
LH: loop header
LB: loop body
LE: loop exit
PB: predicated region body
PF: predicated region fallthrough
CT: control target
= control target key end

     0   :  { %7 = vsyncpa [#allocation3], 0  ;;  %s1826_s0 = inlined_call_operand.hbm [shape: f32[8,16], index: 0, kind: input, shape index: {}]   ;;  %s1827_s1 = inlined_call_operand.hbm [shape: f32[32,384], index: 1, kind: input, shape index: {}]   ;;  %s1828_s2 = inlined_call_operand.hbm [shape: f32[8,128], index: 2, kind: output, shape index: {}]  }
   0x1   :  { %8 = vsyncpa [#allocation6], 0 }
   0x2   :  { %9 = vsyncpa [#allocation4], 0  ;;  %s1508_s9 = smov [#allocation2]   ;;  %s1509_s11 = smov [#allocation5]  }
   0x3   :  { %s16_s10 = sshll.u32 %s1508_s9, 4  ;;  %s25_s12 = sshll.u32 %s1509_s11, 4  ;;  %s17_s10 = int_to_ptr.vmem [resolvable:$true] %s16_s10  ;;  %s26_s12 = int_to_ptr.vmem [resolvable:$true] %s25_s12 }
   0x4   :  { %s1450_s13 = scalar_lea.vmem %s17_s10, 128  ;;  %p1455_p1 = scmp.lt.s32.totalorder %s17_s10, %s17_s10 }
   0x5   :  { %p1451_p0 = scmp.ne.s32.totalorder %s17_s10, %s1450_s13  ;;  %p1456_p2 = scmp.lt.s32.totalorder %s1450_s13, %s1450_s13 }
   0x7   :  { %p1457_p3 = por %p1456_p2, %p1455_p1 }
   0x9   :  { %p1458_p4 = pnand %p1457_p3, %p1451_p0 }
   0xb   :  { %1461 = shalt.err (!%p1458_p4)
}
   0xc   :  { %19 = dma.hbm_to_vmem [thread:$0]  %s1826_s0, 128, %s17_s10, [#allocation3]  }
   0xd   :  { %s1470_s16 = scalar_lea.vmem %s26_s12, 1536  ;;  %p1475_p6 = scmp.lt.s32.totalorder %s26_s12, %s26_s12 }
   0xe   :  { %p1471_p5 = scmp.ne.s32.totalorder %s26_s12, %s1470_s16  ;;  %p1476_p7 = scmp.lt.s32.totalorder %s1470_s16, %s1470_s16 }
  0x10   :  { %p1477_p8 = por %p1476_p7, %p1475_p6 }
  0x12   :  { %p1478_p9 = pnand %p1477_p8, %p1471_p5 }
  0x14   :  { %1481 = shalt.err (!%p1478_p9)
}
  0x15   :  { %s1510_s17 = smov 384   ;;  %s1511_s18 = smov 24  }
  0x16   :  { %31 = dma.hbm_to_vmem [thread:$0]  %s1827_s1, 1536, %s26_s12, [#allocation6], %s1510_s17, %s1510_s17, %s1511_s18  }
  0x17   :  { %1502 = dma.done.wait [#allocation3], 128  }
  0x18   :  { %1503 = vsyncadd [#allocation3], 4294967168 }
  0x19   :  { %1504 = dma.done.wait [#allocation6], 1536  }
  0x1a   :  { %1505 = vsyncadd [#allocation6], 4294965760  ;;  %v1512_v0 = vmov 0.0   ;;  %vm1513_vm0 = vmmov 0   ;;  %v39_v1 = vld [vmem:[#allocation5 + $0x18] sm:$0xff]  ;;  %v38_v2 = vld [vmem:[#allocation5] sm:$0xff]  ;;  %v51_v37 = vlaneseq }
  0x1b   :  { %1355 = vmatprep.subr.mxu0 %v1512_v0  ;;  %1304 = vst [vmem:[#allocation7] sm:$0xff] %v1512_v0  ;;  %1359 = vmatprep.mubr.msk.f32.mxu0 %vm1513_vm0, %v1512_v0  ;;  %v55_v3 = vld [vmem:[#allocation2] sm:$0xff]  ;;  %vm56_vm1 = vcmask 130048   ;;  %v41_v4 = vld [vmem:[#allocation5 + $0x48] ss:$0 sm:$0xff]  ;;  %v1545_v6 = vld [vmem:[#allocation5 + $0x30] sm:$0xff] }
  0x1c   :  { %226 = vmatprep.mubr.f32.mxu1 %v1512_v0  ;;  %1356 = vmatpush3.msra.mxu0 %v39_v1  ;;  %s1514_s0 = smov 64   ;;  %s1515_s1 = smov 32   ;;  %v1556_v20 = vld [vmem:[#allocation5 + $0x58] sm:$0xff]  ;;  %v1558_v21 = vld [vmem:[#allocation5 + $0x50] sm:$0xff]  ;;  %v1560_v22 = vld [vmem:[#allocation5 + $0x40] sm:$0xff]  ;;  %vm159_vm2 = vcmask 261120  }
  0x1d   :  { %1357 = vmatprep.subr.mxu0 %v1512_v0  ;;  %186 = vmatprep.subr.mxu1 %v1556_v20  ;;  %v1563_v23 = vld [vmem:[#allocation5 + $0x38] sm:$0xff]  ;;  %v1567_v24 = vld [vmem:[#allocation5 + $0x28] sm:$0xff]  ;;  %v1571_v25 = vld [vmem:[#allocation5 + $0x20] sm:$0xff]  ;;  %vm240_vm3 = vcmask 57344   ;;  %v1609_v38 = vand.u32 127, %v51_v37  ;;  %v1614_v49 = vshrl.u32 %v51_v37, 7 }
  0x1e   :  { %1358 = vmatpush3.msra.mxu0 %v38_v2  ;;  %187 = vmatpush1.msra.mxu1 %v1558_v21  ;;  %v1575_v26 = vld [vmem:[#allocation5 + $0x10] sm:$0xff]  ;;  %v1579_v27 = vld [vmem:[#allocation5 + $0x8] sm:$0xff]  ;;  %s1516_s21 = smov 8   ;;  %s1517_s22 = smov [#allocation7]  }
  0x1f   :  { %1360 = vmatmul.mubr.msk.f32.vlgmr.msra.gmra.mxu0 %vm56_vm1, %v55_v3  ;;  %335 = vmatprep.subr.mxu0 %v1556_v20  ;;  %v1602_v33 = vld [vmem:[#allocation5 + $0x49] ss:$0 sm:$0xff]  ;;  %v1617_v53 = vsub.s32 0, %v1614_v49  ;;  %s1325_s23 = sshll.u32 %s1517_s22, 4  ;;  %s1326_s23 = int_to_ptr.vmem [resolvable:$true] %s1325_s23 }
  0x20   :  { %375 = vmatprep.mubr.f32.mxu0 %v1512_v0  ;;  %336 = vmatpush1.msra.mxu0 %v1558_v21  ;;  %s1482_s24 = scalar_lea.vmem %s1326_s23, 128  ;;  %p1487_p11 = scmp.lt.s32.totalorder %s1326_s23, %s1326_s23 }
  0x21   :  { %188 = vmatprep.subr.mxu1 %v1560_v22  ;;  %337 = vmatprep.subr.mxu0 %v1560_v22  ;;  %p1483_p10 = scmp.ne.s32.totalorder %s1326_s23, %s1482_s24  ;;  %p1488_p12 = scmp.lt.s32.totalorder %s1482_s24, %s1482_s24 }
  0x22   :  { %189 = vmatpush1.msra.mxu1 %v1563_v23  ;;  %338 = vmatpush1.msra.mxu0 %v1563_v23 }
  0x23   :  { %190 = vmatprep.subr.mxu1 %v1567_v24  ;;  %339 = vmatprep.subr.mxu0 %v1567_v24  ;;  %p1489_p13 = por %p1488_p12, %p1487_p11 }
  0x24   :  { %191 = vmatpush1.msra.mxu1 %v1571_v25  ;;  %340 = vmatpush1.msra.mxu0 %v1571_v25 }
  0x25   :  { %192 = vmatprep.subr.mxu1 %v1575_v26  ;;  %341 = vmatprep.subr.mxu0 %v1575_v26  ;;  %p1490_p0 = pnand %p1489_p13, %p1483_p10 }
  0x26   :  { %193 = vmatpush1.msra.mxu1 %v1579_v27  ;;  %342 = vmatpush1.msra.mxu0 %v1579_v27 }
  0x27   :  { %483 = vmatprep.subr.mxu1 %v1556_v20  ;;  %631 = vmatprep.subr.mxu0 %v1556_v20 }
  0xdf   :  { %v126_v5 = vpop.f32.mrf.mxu0 }
  0xe0   :  { %v1547_v7 = vadd.f32 %v126_v5, %v41_v4 }
  0xe1   :  { %v1361_v8 = vpop.f32.mrf.mxu0 }
  0xe2   :  { %v130_v9 = vadd.f32 %v1547_v7, %v1545_v6 }
  0xe4   :  { %1372 = vtanh.f32 %v130_v9  ;;  %v1336_v11 = vmul.f32 -1.442695, %v130_v9 }
  0xe6   :  { %1374 = vpow2.f32 %v1336_v11 }
  0xf1   :  { %v1373_v10 = vpop.eup %1372 }
  0xf2   :  { %141 = vrot.lane.b32.xlu0 %v1373_v10, %s1514_s0 }
  0xf3   :  { %v1375_v12 = vpop.eup %1374 }
  0xf4   :  { %v135_v13 = vadd.f32 1.0, %v1375_v12 }
  0xf6   :  { %1376 = vrcp.f32 %v135_v13 }
 0x103   :  { %v1377_v14 = vpop.eup %1376 }
 0x104   :  { %v139_v17 = vmul.f32 0.0, %v1377_v14 }
 0x164   :  { %v142_v15 = vpop.permute.xlu0 %141 }
 0x165   :  { %v144_v16 = vmul.f32 %v1377_v14, %v142_v15 }
 0x167   :  { %146 = vrot.lane.b32.xlu0 %v144_v16, %s1515_s1 }
 0x1d9   :  { %v147_v18 = vpop.permute.xlu0 %146 }
 0x1da   :  { %v1553_v19 = vadd.f32 %v147_v18, %v139_v17 }
 0x1dc   :  { %1378 = vtanh.f32 %v1553_v19  ;;  %v286_v12 = vrot.slane %v1553_v19, 7 }
 0x1e9   :  { %v1379_v28 = vpop.eup %1378 }
 0x1ea   :  { %152 = vrot.lane.b32.xlu1 %v1379_v28, %s1514_s0 }
 0x25c   :  { %v153_v29 = vpop.permute.xlu1 %152 }
 0x25d   :  { %v155_v30 = vmul.f32 %v1377_v14, %v153_v29 }
 0x25f   :  { %157 = vrot.lane.b32.xlu1 %v155_v30, %s1515_s1 }
 0x2d1   :  { %v158_v31 = vpop.permute.xlu1 %157 }
 0x2d2   :  { %1337 = vmatmul.mubr.msk.f32.vlgmr.msra.gmra.mxu1 %vm159_vm2, %v158_v31 }
 0x2d3   :  { %484 = vmatpush1.msra.mxu1 %v1558_v21  ;;  %523 = vmatprep.mubr.f32.mxu1 %v1512_v0 }
 0x2d4   :  { %485 = vmatprep.subr.mxu1 %v1560_v22 }
 0x2d5   :  { %486 = vmatpush1.msra.mxu1 %v1563_v23 }
 0x2d6   :  { %487 = vmatprep.subr.mxu1 %v1567_v24 }
 0x2d7   :  { %488 = vmatpush1.msra.mxu1 %v1571_v25 }
 0x2d8   :  { %489 = vmatprep.subr.mxu1 %v1575_v26 }
 0x2d9   :  { %490 = vmatpush1.msra.mxu1 %v1579_v27 }
 0x2da   :  { %779 = vmatprep.subr.mxu1 %v1556_v20 }
 0x392   :  { %v228_v32 = vpop.f32.mrf.mxu1 }
 0x393   :  { %v275_v63 = vrot.slane %v228_v32, 7 }
 0x394   :  { %v230_v34 = vpop.f32.mrf.mxu1 }
 0x395   :  { %v1605_v35 = vadd.f32 %v230_v34, %v1602_v33 }
 0x397   :  { %v241_v36 = vsel %vm240_vm3, %v1605_v35, -inf }
 0x398   :  { %242 = vmax.xlane.f32.xlu0 %v241_v36 }
 0x421   :  { %v243_v39 = vpop.xlane.xlu0 %242 }
 0x422   :  { %vm244_vm4 = vcmp.eq.f32.partialorder %v1605_v35, %v243_v39 }
 0x423   :  { %v245_v40 = vsel %vm244_vm4, %v1609_v38, 8 }
 0x424   :  { %v246_v41 = vsel %vm240_vm3, %v245_v40, 2147483647 }
 0x425   :  { %v248_v42 = vshra.s32 %v246_v41, 16  ;;  %v247_v44 = vand.u32 65535, %v246_v41 }
 0x427   :  { %v250_v43 = vcvt.s32.f32 %v248_v42  ;;  %v249_v46 = vcvt.s32.f32 %v247_v44 }
 0x429   :  { %251 = vmin.xlane.f32.xlu1 %v250_v43 }
 0x4b2   :  { %v252_v45 = vpop.xlane.xlu1 %251 }
 0x4b3   :  { %vm253_vm5 = vcmp.eq.f32.partialorder %v250_v43, %v252_v45  ;;  %v258_v48 = vcvt.f32.s32 %v252_v45 }
 0x4b4   :  { %v254_v47 = vsel %vm253_vm5, %v249_v46, inf }
 0x4b5   :  { %255 = vmin.xlane.f32.xlu0 %v254_v47  ;;  %v259_v51 = vshll.u32 %v258_v48, 16 }
 0x53e   :  { %v256_v50 = vpop.xlane.xlu0 %255 }
 0x53f   :  { %v257_v52 = vcvt.f32.s32 %v256_v50 }
 0x541   :  { %v260_v54 = vadd.s32 %v259_v51, %v257_v52 }
 0x543   :  { %v264_v55 = vrot.slane %v260_v54, %v1617_v53 }
 0x545   :  { %vm265_vm6 = vcmp.eq.s32.totalorder %v1614_v49, %v264_v55 }
 0x546   :  { %v266_v56 = vsel %vm265_vm6, %v1545_v6, 0.0 }
 0x547   :  { %v267_v57 = vrot.slane %v266_v56, 4 }
 0x549   :  { %v268_v58 = vadd.f32 %v267_v57, %v266_v56 }
 0x54b   :  { %v269_v59 = vrot.slane %v268_v58, 2 }
 0x54d   :  { %v270_v60 = vadd.f32 %v269_v59, %v268_v58 }
 0x54f   :  { %v271_v61 = vrot.slane %v270_v60, 1 }
 0x551   :  { %v272_v62 = vadd.f32 %v271_v61, %v270_v60 }
 0x553   :  { %v273_v1 = vadd.f32 %v272_v62, %v1547_v7 }
 0x555   :  { %v277_v2 = vadd.f32 %v275_v63, %v273_v1 }
 0x557   :  { %1380 = vtanh.f32 %v277_v2  ;;  %v1338_v4 = vmul.f32 -1.442695, %v277_v2 }
 0x559   :  { %1382 = vpow2.f32 %v1338_v4 }
 0x564   :  { %v1381_v3 = vpop.eup %1380 }
 0x565   :  { %290 = vrot.lane.b32.xlu0 %v1381_v3, %s1514_s0 }
 0x566   :  { %v1383_v5 = vpop.eup %1382 }
 0x567   :  { %v281_v8 = vadd.f32 1.0, %v1383_v5 }
 0x569   :  { %1384 = vrcp.f32 %v281_v8 }
 0x576   :  { %v1385_v9 = vpop.eup %1384 }
 0x577   :  { %v288_v13 = vmul.f32 %v1385_v9, %v286_v12 }
 0x5d7   :  { %v291_v10 = vpop.permute.xlu0 %290 }
 0x5d8   :  { %v293_v11 = vmul.f32 %v1385_v9, %v291_v10 }
 0x5da   :  { %295 = vrot.lane.b32.xlu1 %v293_v11, %s1515_s1 }
 0x64c   :  { %v296_v14 = vpop.permute.xlu1 %295 }
 0x64d   :  { %v1626_v15 = vadd.f32 %v296_v14, %v288_v13 }
 0x64f   :  { %1386 = vtanh.f32 %v1626_v15 }
 0x65c   :  { %v1387_v16 = vpop.eup %1386 }
 0x65d   :  { %301 = vrot.lane.b32.xlu1 %v1387_v16, %s1514_s0 }
 0x6cf   :  { %v302_v17 = vpop.permute.xlu1 %301 }
 0x6d0   :  { %v304_v18 = vmul.f32 %v1385_v9, %v302_v17  ;;  %v434_v9 = vrot.slane %v1626_v15, 7 }
 0x6d2   :  { %v306_v28 = vrot.slane %v304_v18, 1 }
 0x6d4   :  { %307 = vrot.lane.b32.xlu0 %v306_v28, %s1515_s1 }
 0x746   :  { %v308_v29 = vpop.permute.xlu0 %307 }
 0x747   :  { %1339 = vmatmul.mubr.msk.f32.vlgmr.msra.gmra.mxu0 %vm159_vm2, %v308_v29 }
 0x748   :  { %632 = vmatpush1.msra.mxu0 %v1558_v21  ;;  %671 = vmatprep.mubr.f32.mxu0 %v1512_v0 }
 0x749   :  { %633 = vmatprep.subr.mxu0 %v1560_v22 }
 0x74a   :  { %634 = vmatpush1.msra.mxu0 %v1563_v23 }
 0x74b   :  { %635 = vmatprep.subr.mxu0 %v1567_v24 }
 0x74c   :  { %636 = vmatpush1.msra.mxu0 %v1571_v25 }
 0x74d   :  { %637 = vmatprep.subr.mxu0 %v1575_v26 }
 0x74e   :  { %638 = vmatpush1.msra.mxu0 %v1579_v27 }
 0x74f   :  { %927 = vmatprep.subr.mxu0 %v1556_v20 }
 0x807   :  { %v377_v19 = vpop.f32.mrf.mxu0 }
 0x808   :  { %v423_v60 = vrot.slane %v377_v19, 6 }
 0x809   :  { %v379_v30 = vpop.f32.mrf.mxu0 }
 0x80a   :  { %v1642_v31 = vadd.f32 %v379_v30, %v1602_v33 }
 0x80c   :  { %v389_v32 = vsel %vm240_vm3, %v1642_v31, -inf }
 0x80d   :  { %390 = vmax.xlane.f32.xlu1 %v389_v32 }
 0x896   :  { %v391_v34 = vpop.xlane.xlu1 %390 }
 0x897   :  { %vm392_vm7 = vcmp.eq.f32.partialorder %v1642_v31, %v391_v34 }
 0x898   :  { %v393_v36 = vsel %vm392_vm7, %v1609_v38, 8 }
 0x899   :  { %v394_v37 = vsel %vm240_vm3, %v393_v36, 2147483647 }
 0x89a   :  { %v396_v39 = vshra.s32 %v394_v37, 16  ;;  %v395_v41 = vand.u32 65535, %v394_v37 }
 0x89c   :  { %v398_v40 = vcvt.s32.f32 %v396_v39  ;;  %v397_v43 = vcvt.s32.f32 %v395_v41 }
 0x89e   :  { %399 = vmin.xlane.f32.xlu0 %v398_v40 }
 0x927   :  { %v400_v42 = vpop.xlane.xlu0 %399 }
 0x928   :  { %vm401_vm8 = vcmp.eq.f32.partialorder %v398_v40, %v400_v42  ;;  %v406_v45 = vcvt.f32.s32 %v400_v42 }
 0x929   :  { %v402_v44 = vsel %vm401_vm8, %v397_v43, inf }
 0x92a   :  { %403 = vmin.xlane.f32.xlu0 %v402_v44  ;;  %v407_v47 = vshll.u32 %v406_v45, 16 }
 0x9b3   :  { %v404_v46 = vpop.xlane.xlu0 %403 }
 0x9b4   :  { %v405_v48 = vcvt.f32.s32 %v404_v46 }
 0x9b6   :  { %v408_v50 = vadd.s32 %v407_v47, %v405_v48 }
 0x9b8   :  { %v412_v51 = vrot.slane %v408_v50, %v1617_v53 }
 0x9ba   :  { %vm413_vm9 = vcmp.eq.s32.totalorder %v1614_v49, %v412_v51 }
 0x9bb   :  { %v414_v52 = vsel %vm413_vm9, %v1545_v6, 0.0 }
 0x9bc   :  { %v415_v54 = vrot.slane %v414_v52, 4 }
 0x9be   :  { %v416_v55 = vadd.f32 %v415_v54, %v414_v52 }
 0x9c0   :  { %v417_v56 = vrot.slane %v416_v55, 2 }
 0x9c2   :  { %v418_v57 = vadd.f32 %v417_v56, %v416_v55 }
 0x9c4   :  { %v419_v58 = vrot.slane %v418_v57, 1 }
 0x9c6   :  { %v420_v59 = vadd.f32 %v419_v58, %v418_v57 }
 0x9c8   :  { %v421_v61 = vadd.f32 %v420_v59, %v1547_v7 }
 0x9ca   :  { %v425_v62 = vadd.f32 %v423_v60, %v421_v61 }
 0x9cc   :  { %1388 = vtanh.f32 %v425_v62  ;;  %v1340_v1 = vmul.f32 -1.442695, %v425_v62 }
 0x9ce   :  { %1390 = vpow2.f32 %v1340_v1 }
 0x9d9   :  { %v1389_v63 = vpop.eup %1388 }
 0x9da   :  { %438 = vrot.lane.b32.xlu1 %v1389_v63, %s1514_s0 }
 0x9db   :  { %v1391_v2 = vpop.eup %1390 }
 0x9dc   :  { %v429_v3 = vadd.f32 1.0, %v1391_v2 }
 0x9de   :  { %1392 = vrcp.f32 %v429_v3 }
 0x9eb   :  { %v1393_v4 = vpop.eup %1392 }
 0x9ec   :  { %v436_v10 = vmul.f32 %v1393_v4, %v434_v9 }
 0xa4c   :  { %v439_v5 = vpop.permute.xlu1 %438 }
 0xa4d   :  { %v441_v8 = vmul.f32 %v1393_v4, %v439_v5 }
 0xa4f   :  { %443 = vrot.lane.b32.xlu0 %v441_v8, %s1515_s1 }
 0xac1   :  { %v444_v11 = vpop.permute.xlu0 %443 }
 0xac2   :  { %v1656_v12 = vadd.f32 %v444_v11, %v436_v10 }
 0xac4   :  { %1394 = vtanh.f32 %v1656_v12  ;;  %v582_v5 = vrot.slane %v1656_v12, 7 }
 0xad1   :  { %v1395_v13 = vpop.eup %1394 }
 0xad2   :  { %449 = vrot.lane.b32.xlu1 %v1395_v13, %s1514_s0 }
 0xb44   :  { %v450_v14 = vpop.permute.xlu1 %449 }
 0xb45   :  { %v452_v16 = vmul.f32 %v1393_v4, %v450_v14 }
 0xb47   :  { %v454_v17 = vrot.slane %v452_v16, 2 }
 0xb49   :  { %455 = vrot.lane.b32.xlu1 %v454_v17, %s1515_s1 }
 0xbbb   :  { %v456_v18 = vpop.permute.xlu1 %455 }
 0xbbc   :  { %1341 = vmatmul.mubr.msk.f32.vlgmr.msra.gmra.mxu1 %vm159_vm2, %v456_v18 }
 0xbbd   :  { %780 = vmatpush1.msra.mxu1 %v1558_v21  ;;  %819 = vmatprep.mubr.f32.mxu1 %v1512_v0 }
 0xbbe   :  { %781 = vmatprep.subr.mxu1 %v1560_v22 }
 0xbbf   :  { %782 = vmatpush1.msra.mxu1 %v1563_v23 }
 0xbc0   :  { %783 = vmatprep.subr.mxu1 %v1567_v24 }
 0xbc1   :  { %784 = vmatpush1.msra.mxu1 %v1571_v25 }
 0xbc2   :  { %785 = vmatprep.subr.mxu1 %v1575_v26 }
 0xbc3   :  { %786 = vmatpush1.msra.mxu1 %v1579_v27 }
 0xbc4   :  { %1075 = vmatprep.subr.mxu1 %v1556_v20 }
 0xc7c   :  { %v525_v15 = vpop.f32.mrf.mxu1 }
 0xc7d   :  { %v571_v58 = vrot.slane %v525_v15, 5 }
 0xc7e   :  { %v527_v28 = vpop.f32.mrf.mxu1 }
 0xc7f   :  { %v1672_v29 = vadd.f32 %v527_v28, %v1602_v33 }
 0xc81   :  { %v537_v19 = vsel %vm240_vm3, %v1672_v29, -inf }
 0xc82   :  { %538 = vmax.xlane.f32.xlu0 %v537_v19 }
 0xd0b   :  { %v539_v30 = vpop.xlane.xlu0 %538 }
 0xd0c   :  { %vm540_vm10 = vcmp.eq.f32.partialorder %v1672_v29, %v539_v30 }
 0xd0d   :  { %v541_v32 = vsel %vm540_vm10, %v1609_v38, 8 }
 0xd0e   :  { %v542_v34 = vsel %vm240_vm3, %v541_v32, 2147483647 }
 0xd0f   :  { %v544_v36 = vshra.s32 %v542_v34, 16  ;;  %v543_v39 = vand.u32 65535, %v542_v34 }
 0xd11   :  { %v546_v37 = vcvt.s32.f32 %v544_v36  ;;  %v545_v41 = vcvt.s32.f32 %v543_v39 }
 0xd13   :  { %547 = vmin.xlane.f32.xlu1 %v546_v37 }
 0xd9c   :  { %v548_v40 = vpop.xlane.xlu1 %547 }
 0xd9d   :  { %vm549_vm11 = vcmp.eq.f32.partialorder %v546_v37, %v548_v40  ;;  %v554_v43 = vcvt.f32.s32 %v548_v40 }
 0xd9e   :  { %v550_v42 = vsel %vm549_vm11, %v545_v41, inf  ;;  %vm383_vm11 = vcmp.eq.s32.totalorder %v1614_v49, 1 }
 0xd9f   :  { %551 = vmin.xlane.f32.xlu0 %v550_v42  ;;  %v555_v45 = vshll.u32 %v554_v43, 16 }
 0xe28   :  { %v552_v44 = vpop.xlane.xlu0 %551 }
 0xe29   :  { %v553_v46 = vcvt.f32.s32 %v552_v44 }
 0xe2b   :  { %v556_v47 = vadd.s32 %v555_v45, %v553_v46 }
 0xe2d   :  { %v560_v48 = vrot.slane %v556_v47, %v1617_v53 }
 0xe2f   :  { %vm561_vm12 = vcmp.eq.s32.totalorder %v1614_v49, %v560_v48 }
 0xe30   :  { %v562_v50 = vsel %vm561_vm12, %v1545_v6, 0.0  ;;  %vm531_vm12 = vcmp.eq.s32.totalorder %v1614_v49, 2 }
 0xe31   :  { %v563_v51 = vrot.slane %v562_v50, 4 }
 0xe33   :  { %v564_v52 = vadd.f32 %v563_v51, %v562_v50 }
 0xe35   :  { %v565_v54 = vrot.slane %v564_v52, 2 }
 0xe37   :  { %v566_v55 = vadd.f32 %v565_v54, %v564_v52 }
 0xe39   :  { %v567_v56 = vrot.slane %v566_v55, 1 }
 0xe3b   :  { %v568_v57 = vadd.f32 %v567_v56, %v566_v55 }
 0xe3d   :  { %v569_v59 = vadd.f32 %v568_v57, %v1547_v7 }
 0xe3f   :  { %v573_v60 = vadd.f32 %v571_v58, %v569_v59 }
 0xe41   :  { %1396 = vtanh.f32 %v573_v60  ;;  %v1342_v62 = vmul.f32 -1.442695, %v573_v60 }
 0xe43   :  { %1398 = vpow2.f32 %v1342_v62 }
 0xe4e   :  { %v1397_v61 = vpop.eup %1396 }
 0xe4f   :  { %586 = vrot.lane.b32.xlu0 %v1397_v61, %s1514_s0 }
 0xe50   :  { %v1399_v63 = vpop.eup %1398 }
 0xe51   :  { %v577_v1 = vadd.f32 1.0, %v1399_v63 }
 0xe53   :  { %1400 = vrcp.f32 %v577_v1 }
 0xe60   :  { %v1401_v2 = vpop.eup %1400 }
 0xe61   :  { %v584_v8 = vmul.f32 %v1401_v2, %v582_v5 }
 0xec1   :  { %v587_v3 = vpop.permute.xlu0 %586 }
 0xec2   :  { %v589_v4 = vmul.f32 %v1401_v2, %v587_v3 }
 0xec4   :  { %591 = vrot.lane.b32.xlu1 %v589_v4, %s1515_s1 }
 0xf36   :  { %v592_v9 = vpop.permute.xlu1 %591 }
 0xf37   :  { %v1686_v10 = vadd.f32 %v592_v9, %v584_v8 }
 0xf39   :  { %1402 = vtanh.f32 %v1686_v10  ;;  %v730_v3 = vrot.slane %v1686_v10, 7 }
 0xf46   :  { %v1403_v11 = vpop.eup %1402 }
 0xf47   :  { %597 = vrot.lane.b32.xlu1 %v1403_v11, %s1514_s0 }
 0xfb9   :  { %v598_v13 = vpop.permute.xlu1 %597 }
 0xfba   :  { %v600_v14 = vmul.f32 %v1401_v2, %v598_v13 }
 0xfbc   :  { %v602_v16 = vrot.slane %v600_v14, 3 }
 0xfbe   :  { %603 = vrot.lane.b32.xlu0 %v602_v16, %s1515_s1 }
0x1030   :  { %v604_v17 = vpop.permute.xlu0 %603 }
0x1031   :  { %1343 = vmatmul.mubr.msk.f32.vlgmr.msra.gmra.mxu0 %vm159_vm2, %v604_v17 }
0x1032   :  { %928 = vmatpush1.msra.mxu0 %v1558_v21  ;;  %967 = vmatprep.mubr.f32.mxu0 %v1512_v0 }
0x1033   :  { %929 = vmatprep.subr.mxu0 %v1560_v22 }
0x1034   :  { %930 = vmatpush1.msra.mxu0 %v1563_v23 }
0x1035   :  { %931 = vmatprep.subr.mxu0 %v1567_v24 }
0x1036   :  { %932 = vmatpush1.msra.mxu0 %v1571_v25 }
0x1037   :  { %933 = vmatprep.subr.mxu0 %v1575_v26 }
0x1038   :  { %934 = vmatpush1.msra.mxu0 %v1579_v27 }
0x1039   :  { %1223 = vmatprep.subr.mxu0 %v1556_v20 }
0x10f1   :  { %v673_v12 = vpop.f32.mrf.mxu0 }
0x10f2   :  { %v719_v56 = vrot.slane %v673_v12, 4 }
0x10f3   :  { %v675_v18 = vpop.f32.mrf.mxu0 }
0x10f4   :  { %v1702_v15 = vadd.f32 %v675_v18, %v1602_v33 }
0x10f6   :  { %v685_v28 = vsel %vm240_vm3, %v1702_v15, -inf }
0x10f7   :  { %686 = vmax.xlane.f32.xlu1 %v685_v28 }
0x1180   :  { %v687_v19 = vpop.xlane.xlu1 %686 }
0x1181   :  { %vm688_vm13 = vcmp.eq.f32.partialorder %v1702_v15, %v687_v19 }
0x1182   :  { %v689_v30 = vsel %vm688_vm13, %v1609_v38, 8  ;;  %vm827_vm13 = vcmp.eq.s32.totalorder %v1614_v49, 4 }
0x1183   :  { %v690_v32 = vsel %vm240_vm3, %v689_v30, 2147483647 }
0x1184   :  { %v692_v34 = vshra.s32 %v690_v32, 16  ;;  %v691_v20 = vand.u32 65535, %v690_v32 }
0x1186   :  { %v694_v36 = vcvt.s32.f32 %v692_v34  ;;  %v693_v39 = vcvt.s32.f32 %v691_v20 }
0x1188   :  { %695 = vmin.xlane.f32.xlu0 %v694_v36 }
0x1211   :  { %v696_v37 = vpop.xlane.xlu0 %695 }
0x1212   :  { %vm697_vm14 = vcmp.eq.f32.partialorder %v694_v36, %v696_v37  ;;  %v702_v41 = vcvt.f32.s32 %v696_v37 }
0x1213   :  { %v698_v40 = vsel %vm697_vm14, %v693_v39, inf  ;;  %vm975_vm14 = vcmp.eq.s32.totalorder %v1614_v49, 5 }
0x1214   :  { %699 = vmin.xlane.f32.xlu0 %v698_v40  ;;  %v703_v43 = vshll.u32 %v702_v41, 16 }
0x129d   :  { %v700_v42 = vpop.xlane.xlu0 %699 }
0x129e   :  { %v701_v44 = vcvt.f32.s32 %v700_v42 }
0x12a0   :  { %v704_v45 = vadd.s32 %v703_v43, %v701_v44 }
0x12a2   :  { %v708_v46 = vrot.slane %v704_v45, %v1617_v53 }
0x12a4   :  { %vm709_vm15 = vcmp.eq.s32.totalorder %v1614_v49, %v708_v46 }
0x12a5   :  { %v710_v47 = vsel %vm709_vm15, %v1545_v6, 0.0  ;;  %vm1123_vm15 = vcmp.eq.s32.totalorder %v1614_v49, 6 }
0x12a6   :  { %v711_v48 = vrot.slane %v710_v47, 4 }
0x12a8   :  { %v712_v50 = vadd.f32 %v711_v48, %v710_v47 }
0x12aa   :  { %v713_v51 = vrot.slane %v712_v50, 2 }
0x12ac   :  { %v714_v52 = vadd.f32 %v713_v51, %v712_v50 }
0x12ae   :  { %v715_v54 = vrot.slane %v714_v52, 1 }
0x12b0   :  { %v716_v55 = vadd.f32 %v715_v54, %v714_v52 }
0x12b2   :  { %v717_v57 = vadd.f32 %v716_v55, %v1547_v7 }
0x12b4   :  { %v721_v58 = vadd.f32 %v719_v56, %v717_v57 }
0x12b6   :  { %1404 = vtanh.f32 %v721_v58  ;;  %v1344_v60 = vmul.f32 -1.442695, %v721_v58 }
0x12b8   :  { %1406 = vpow2.f32 %v1344_v60 }
0x12c3   :  { %v1405_v59 = vpop.eup %1404 }
0x12c4   :  { %734 = vrot.lane.b32.xlu1 %v1405_v59, %s1514_s0 }
0x12c5   :  { %v1407_v61 = vpop.eup %1406 }
0x12c6   :  { %v725_v62 = vadd.f32 1.0, %v1407_v61 }
0x12c8   :  { %1408 = vrcp.f32 %v725_v62 }
0x12d5   :  { %v1409_v63 = vpop.eup %1408 }
0x12d6   :  { %v732_v4 = vmul.f32 %v1409_v63, %v730_v3 }
0x1336   :  { %v735_v1 = vpop.permute.xlu1 %734 }
0x1337   :  { %v737_v2 = vmul.f32 %v1409_v63, %v735_v1 }
0x1339   :  { %739 = vrot.lane.b32.xlu0 %v737_v2, %s1515_s1 }
0x13ab   :  { %v740_v5 = vpop.permute.xlu0 %739 }
0x13ac   :  { %v1716_v8 = vadd.f32 %v740_v5, %v732_v4 }
0x13ae   :  { %1410 = vtanh.f32 %v1716_v8  ;;  %v878_v2 = vrot.slane %v1716_v8, 7 }
0x13bb   :  { %v1411_v9 = vpop.eup %1410 }
0x13bc   :  { %745 = vrot.lane.b32.xlu1 %v1411_v9, %s1514_s0 }
0x142e   :  { %v746_v11 = vpop.permute.xlu1 %745 }
0x142f   :  { %v748_v13 = vmul.f32 %v1409_v63, %v746_v11 }
0x1431   :  { %v750_v14 = vrot.slane %v748_v13, 4 }
0x1433   :  { %751 = vrot.lane.b32.xlu1 %v750_v14, %s1515_s1 }
0x14a5   :  { %v752_v16 = vpop.permute.xlu1 %751 }
0x14a6   :  { %1345 = vmatmul.mubr.msk.f32.vlgmr.msra.gmra.mxu1 %vm159_vm2, %v752_v16 }
0x14a7   :  { %1076 = vmatpush1.msra.mxu1 %v1558_v21  ;;  %1115 = vmatprep.mubr.f32.mxu1 %v1512_v0 }
0x14a8   :  { %1077 = vmatprep.subr.mxu1 %v1560_v22 }
0x14a9   :  { %1078 = vmatpush1.msra.mxu1 %v1563_v23 }
0x14aa   :  { %1079 = vmatprep.subr.mxu1 %v1567_v24 }
0x14ab   :  { %1080 = vmatpush1.msra.mxu1 %v1571_v25 }
0x14ac   :  { %1081 = vmatprep.subr.mxu1 %v1575_v26 }
0x14ad   :  { %1082 = vmatpush1.msra.mxu1 %v1579_v27 }
0x1566   :  { %v821_v10 = vpop.f32.mrf.mxu1 }
0x1567   :  { %v867_v55 = vrot.slane %v821_v10, 3 }
0x1568   :  { %v823_v17 = vpop.f32.mrf.mxu1 }
0x1569   :  { %v1731_v12 = vadd.f32 %v823_v17, %v1602_v33 }
0x156b   :  { %v833_v18 = vsel %vm240_vm3, %v1731_v12, -inf }
0x156c   :  { %834 = vmax.xlane.f32.xlu0 %v833_v18 }
0x15f5   :  { %v835_v28 = vpop.xlane.xlu0 %834 }
0x15f6   :  { %vm836_vm0 = vcmp.eq.f32.partialorder %v1731_v12, %v835_v28 }
0x15f7   :  { %v837_v19 = vsel %vm836_vm0, %v1609_v38, 8  ;;  %vm1270_vm0 = vcmp.eq.s32.totalorder %v1614_v49, 7 }
0x15f8   :  { %v838_v30 = vsel %vm240_vm3, %v837_v19, 2147483647 }
0x15f9   :  { %v840_v32 = vshra.s32 %v838_v30, 16  ;;  %v839_v36 = vand.u32 65535, %v838_v30 }
0x15fb   :  { %v842_v34 = vcvt.s32.f32 %v840_v32  ;;  %v841_v37 = vcvt.s32.f32 %v839_v36 }
0x15fd   :  { %843 = vmin.xlane.f32.xlu1 %v842_v34 }
0x1686   :  { %v844_v20 = vpop.xlane.xlu1 %843 }
0x1687   :  { %vm845_vm1 = vcmp.eq.f32.partialorder %v842_v34, %v844_v20  ;;  %v850_v40 = vcvt.f32.s32 %v844_v20 }
0x1688   :  { %v846_v39 = vsel %vm845_vm1, %v841_v37, inf  ;;  %vm1276_vm1 = vcmask 64512  }
0x1689   :  { %847 = vmin.xlane.f32.xlu0 %v846_v39  ;;  %v851_v42 = vshll.u32 %v850_v40, 16 }
0x1712   :  { %v848_v41 = vpop.xlane.xlu0 %847 }
0x1713   :  { %v849_v43 = vcvt.f32.s32 %v848_v41 }
0x1715   :  { %v852_v44 = vadd.s32 %v851_v42, %v849_v43 }
0x1717   :  { %v856_v45 = vrot.slane %v852_v44, %v1617_v53 }
0x1719   :  { %vm857_vm4 = vcmp.eq.s32.totalorder %v1614_v49, %v856_v45 }
0x171a   :  { %v858_v46 = vsel %vm857_vm4, %v1545_v6, 0.0 }
0x171b   :  { %v859_v47 = vrot.slane %v858_v46, 4 }
0x171d   :  { %v860_v48 = vadd.f32 %v859_v47, %v858_v46 }
0x171f   :  { %v861_v50 = vrot.slane %v860_v48, 2 }
0x1721   :  { %v862_v51 = vadd.f32 %v861_v50, %v860_v48 }
0x1723   :  { %v863_v52 = vrot.slane %v862_v51, 1 }
0x1725   :  { %v864_v54 = vadd.f32 %v863_v52, %v862_v51 }
0x1727   :  { %v865_v56 = vadd.f32 %v864_v54, %v1547_v7 }
0x1729   :  { %v869_v57 = vadd.f32 %v867_v55, %v865_v56 }
0x172b   :  { %1412 = vtanh.f32 %v869_v57  ;;  %v1346_v59 = vmul.f32 -1.442695, %v869_v57 }
0x172d   :  { %1414 = vpow2.f32 %v1346_v59 }
0x1738   :  { %v1413_v58 = vpop.eup %1412 }
0x1739   :  { %882 = vrot.lane.b32.xlu0 %v1413_v58, %s1514_s0 }
0x173a   :  { %v1415_v60 = vpop.eup %1414 }
0x173b   :  { %v873_v61 = vadd.f32 1.0, %v1415_v60 }
0x173d   :  { %1416 = vrcp.f32 %v873_v61 }
0x174a   :  { %v1417_v62 = vpop.eup %1416 }
0x174b   :  { %v880_v3 = vmul.f32 %v1417_v62, %v878_v2 }
0x17ab   :  { %v883_v63 = vpop.permute.xlu0 %882 }
0x17ac   :  { %v885_v1 = vmul.f32 %v1417_v62, %v883_v63 }
0x17ae   :  { %887 = vrot.lane.b32.xlu1 %v885_v1, %s1515_s1 }
0x1820   :  { %v888_v4 = vpop.permute.xlu1 %887 }
0x1821   :  { %v1745_v5 = vadd.f32 %v888_v4, %v880_v3 }
0x1823   :  { %1418 = vtanh.f32 %v1745_v5  ;;  %v1026_v57 = vrot.slane %v1745_v5, 7 }
0x1830   :  { %v1419_v9 = vpop.eup %1418 }
0x1831   :  { %893 = vrot.lane.b32.xlu1 %v1419_v9, %s1514_s0 }
0x18a3   :  { %v894_v11 = vpop.permute.xlu1 %893 }
0x18a4   :  { %v896_v13 = vmul.f32 %v1417_v62, %v894_v11 }
0x18a6   :  { %v898_v14 = vrot.slane %v896_v13, 5 }
0x18a8   :  { %899 = vrot.lane.b32.xlu0 %v898_v14, %s1515_s1 }
0x191a   :  { %v900_v16 = vpop.permute.xlu0 %899 }
0x191b   :  { %1347 = vmatmul.mubr.msk.f32.vlgmr.msra.gmra.mxu0 %vm159_vm2, %v900_v16 }
0x191c   :  { %1224 = vmatpush1.msra.mxu0 %v1558_v21  ;;  %1263 = vmatprep.mubr.f32.mxu0 %v1512_v0 }
0x191d   :  { %1225 = vmatprep.subr.mxu0 %v1560_v22 }
0x191e   :  { %1226 = vmatpush1.msra.mxu0 %v1563_v23 }
0x191f   :  { %1227 = vmatprep.subr.mxu0 %v1567_v24 }
0x1920   :  { %1228 = vmatpush1.msra.mxu0 %v1571_v25 }
0x1921   :  { %1229 = vmatprep.subr.mxu0 %v1575_v26 }
0x1922   :  { %1230 = vmatpush1.msra.mxu0 %v1579_v27 }
0x19db   :  { %v969_v8 = vpop.f32.mrf.mxu0 }
0x19dc   :  { %v1015_v45 = vrot.slane %v969_v8, 2 }
0x19dd   :  { %v971_v10 = vpop.f32.mrf.mxu0 }
0x19de   :  { %v1760_v17 = vadd.f32 %v971_v10, %v1602_v33 }
0x19e0   :  { %v981_v0 = vsel %vm240_vm3, %v1760_v17, -inf }
0x19e1   :  { %982 = vmax.xlane.f32.xlu1 %v981_v0 }
0x1a6a   :  { %v983_v21 = vpop.xlane.xlu1 %982 }
0x1a6b   :  { %vm984_vm5 = vcmp.eq.f32.partialorder %v1760_v17, %v983_v21 }
0x1a6c   :  { %v985_v22 = vsel %vm984_vm5, %v1609_v38, 8 }
0x1a6d   :  { %v986_v23 = vsel %vm240_vm3, %v985_v22, 2147483647 }
0x1a6e   :  { %v988_v24 = vshra.s32 %v986_v23, 16  ;;  %v987_v26 = vand.u32 65535, %v986_v23 }
0x1a70   :  { %v990_v25 = vcvt.s32.f32 %v988_v24  ;;  %v989_v18 = vcvt.s32.f32 %v987_v26 }
0x1a72   :  { %991 = vmin.xlane.f32.xlu0 %v990_v25 }
0x1afb   :  { %v992_v27 = vpop.xlane.xlu0 %991 }
0x1afc   :  { %vm993_vm6 = vcmp.eq.f32.partialorder %v990_v25, %v992_v27  ;;  %v998_v19 = vcvt.f32.s32 %v992_v27 }
0x1afd   :  { %v994_v28 = vsel %vm993_vm6, %v989_v18, inf  ;;  %vm1315_vm6 = vcmask 130112  }
0x1afe   :  { %995 = vmin.xlane.f32.xlu0 %v994_v28  ;;  %v999_v32 = vshll.u32 %v998_v19, 16 }
0x1b87   :  { %v996_v30 = vpop.xlane.xlu0 %995 }
0x1b88   :  { %v997_v34 = vcvt.f32.s32 %v996_v30 }
0x1b8a   :  { %v1000_v36 = vadd.s32 %v999_v32, %v997_v34 }
0x1b8c   :  { %v1004_v20 = vrot.slane %v1000_v36, %v1617_v53 }
0x1b8e   :  { %vm1005_vm7 = vcmp.eq.s32.totalorder %v1614_v49, %v1004_v20 }
0x1b8f   :  { %v1006_v37 = vsel %vm1005_vm7, %v1545_v6, 0.0  ;;  %vm1317_vm7 = vcmask 138368  }
0x1b90   :  { %v1007_v39 = vrot.slane %v1006_v37, 4 }
0x1b92   :  { %v1008_v40 = vadd.f32 %v1007_v39, %v1006_v37 }
0x1b94   :  { %v1009_v41 = vrot.slane %v1008_v40, 2 }
0x1b96   :  { %v1010_v42 = vadd.f32 %v1009_v41, %v1008_v40 }
0x1b98   :  { %v1011_v43 = vrot.slane %v1010_v42, 1 }
0x1b9a   :  { %v1012_v44 = vadd.f32 %v1011_v43, %v1010_v42 }
0x1b9c   :  { %v1013_v46 = vadd.f32 %v1012_v44, %v1547_v7 }
0x1b9e   :  { %v1017_v47 = vadd.f32 %v1015_v45, %v1013_v46 }
0x1ba0   :  { %1420 = vtanh.f32 %v1017_v47  ;;  %v1348_v50 = vmul.f32 -1.442695, %v1017_v47 }
0x1ba2   :  { %1422 = vpow2.f32 %v1348_v50 }
0x1bad   :  { %v1421_v48 = vpop.eup %1420 }
0x1bae   :  { %1030 = vrot.lane.b32.xlu1 %v1421_v48, %s1514_s0 }
0x1baf   :  { %v1423_v51 = vpop.eup %1422 }
0x1bb0   :  { %v1021_v52 = vadd.f32 1.0, %v1423_v51 }
0x1bb2   :  { %1424 = vrcp.f32 %v1021_v52 }
0x1bbf   :  { %v1425_v54 = vpop.eup %1424 }
0x1bc0   :  { %v1028_v58 = vmul.f32 %v1425_v54, %v1026_v57  ;;  %v238_v57 = vrot.slane %v1605_v35, %v1617_v53  ;;  %v831_v35 = vrot.slane %v1731_v12, %v1617_v53 }
0x1c20   :  { %v1031_v55 = vpop.permute.xlu1 %1030 }
0x1c21   :  { %v1033_v56 = vmul.f32 %v1425_v54, %v1031_v55 }
0x1c23   :  { %1035 = vrot.lane.b32.xlu0 %v1033_v56, %s1515_s1 }
0x1c95   :  { %v1036_v59 = vpop.permute.xlu0 %1035 }
0x1c96   :  { %v1038_v60 = vadd.f32 %v1036_v59, %v1028_v58  ;;  %v387_v58 = vrot.slane %v1642_v31, %v1617_v53  ;;  %v535_v59 = vrot.slane %v1672_v29, %v1617_v53  ;;  %v979_v31 = vrot.slane %v1760_v17, %v1617_v53 }
0x1c98   :  { %1426 = vtanh.f32 %v1038_v60  ;;  %v1174_v47 = vrot.slane %v1038_v60, 7  ;;  %v683_v60 = vrot.slane %v1702_v15, %v1617_v53 }
0x1ca5   :  { %v1427_v61 = vpop.eup %1426 }
0x1ca6   :  { %1041 = vrot.lane.b32.xlu1 %v1427_v61, %s1514_s0 }
0x1d18   :  { %v1042_v62 = vpop.permute.xlu1 %1041 }
0x1d19   :  { %v1044_v63 = vmul.f32 %v1425_v54, %v1042_v62 }
0x1d1b   :  { %v1046_v1 = vrot.slane %v1044_v63, 6 }
0x1d1d   :  { %1047 = vrot.lane.b32.xlu1 %v1046_v1, %s1515_s1 }
0x1d8f   :  { %v1048_v2 = vpop.permute.xlu1 %1047 }
0x1d90   :  { %1349 = vmatmul.mubr.msk.f32.vlgmr.msra.gmra.mxu1 %vm159_vm2, %v1048_v2 }
0x1e50   :  { %v1117_v3 = vpop.f32.mrf.mxu1 }
0x1e51   :  { %v1163_v37 = vrot.slane %v1117_v3, 1 }
0x1e52   :  { %v1119_v4 = vpop.f32.mrf.mxu1 }
0x1e53   :  { %v1778_v9 = vadd.f32 %v1119_v4, %v1602_v33 }
0x1e55   :  { %v1129_v5 = vsel %vm240_vm3, %v1778_v9, -inf  ;;  %v1127_v29 = vrot.slane %v1778_v9, %v1617_v53 }
0x1e56   :  { %1130 = vmax.xlane.f32.xlu0 %v1129_v5 }
0x1edf   :  { %v1131_v11 = vpop.xlane.xlu0 %1130 }
0x1ee0   :  { %vm1132_vm8 = vcmp.eq.f32.partialorder %v1778_v9, %v1131_v11 }
0x1ee1   :  { %v1133_v13 = vsel %vm1132_vm8, %v1609_v38, 8 }
0x1ee2   :  { %v1134_v14 = vsel %vm240_vm3, %v1133_v13, 2147483647  ;;  %vm234_vm3 = vcmp.eq.s32.totalorder %v1614_v49, 0 }
0x1ee3   :  { %v1136_v16 = vshra.s32 %v1134_v14, 16  ;;  %v1135_v10 = vand.u32 65535, %v1134_v14  ;;  %v239_v61 = vsel %vm234_vm3, %v238_v57, 0.0 }
0x1ee4   :  { %v388_v63 = vsel %vm383_vm11, %v387_v58, %v239_v61 }
0x1ee5   :  { %v1138_v8 = vcvt.s32.f32 %v1136_v16  ;;  %v1137_v21 = vcvt.s32.f32 %v1135_v10  ;;  %v536_v1 = vsel %vm531_vm12, %v535_v59, %v388_v63 }
0x1ee7   :  { %1139 = vmin.xlane.f32.xlu1 %v1138_v8 }
0x1f70   :  { %v1140_v0 = vpop.xlane.xlu1 %1139 }
0x1f71   :  { %vm1141_vm9 = vcmp.eq.f32.partialorder %v1138_v8, %v1140_v0  ;;  %v1146_v23 = vcvt.f32.s32 %v1140_v0 }
0x1f72   :  { %v1142_v22 = vsel %vm1141_vm9, %v1137_v21, inf }
0x1f73   :  { %1143 = vmin.xlane.f32.xlu0 %v1142_v22  ;;  %v1147_v25 = vshll.u32 %v1146_v23, 16 }
0x1ffc   :  { %v1144_v24 = vpop.xlane.xlu0 %1143 }
0x1ffd   :  { %v1145_v26 = vcvt.f32.s32 %v1144_v24 }
0x1fff   :  { %v1148_v27 = vadd.s32 %v1147_v25, %v1145_v26 }
0x2001   :  { %v1152_v18 = vrot.slane %v1148_v27, %v1617_v53 }
0x2003   :  { %vm1153_vm10 = vcmp.eq.s32.totalorder %v1614_v49, %v1152_v18 }
0x2004   :  { %v1154_v28 = vsel %vm1153_vm10, %v1545_v6, 0.0 }
0x2005   :  { %v1155_v19 = vrot.slane %v1154_v28, 4 }
0x2007   :  { %v1156_v30 = vadd.f32 %v1155_v19, %v1154_v28 }
0x2009   :  { %v1157_v32 = vrot.slane %v1156_v30, 2 }
0x200b   :  { %v1158_v34 = vadd.f32 %v1157_v32, %v1156_v30 }
0x200d   :  { %v1159_v36 = vrot.slane %v1158_v34, 1 }
0x200f   :  { %v1160_v20 = vadd.f32 %v1159_v36, %v1158_v34 }
0x2011   :  { %v1161_v39 = vadd.f32 %v1160_v20, %v1547_v7 }
0x2013   :  { %v1165_v40 = vadd.f32 %v1163_v37, %v1161_v39 }
0x2015   :  { %1428 = vtanh.f32 %v1165_v40  ;;  %v1350_v42 = vmul.f32 -1.442695, %v1165_v40 }
0x2017   :  { %1430 = vpow2.f32 %v1350_v42 }
0x2022   :  { %v1429_v41 = vpop.eup %1428 }
0x2023   :  { %1178 = vrot.lane.b32.xlu0 %v1429_v41, %s1514_s0 }
0x2024   :  { %v1431_v43 = vpop.eup %1430 }
0x2025   :  { %v1169_v44 = vadd.f32 1.0, %v1431_v43 }
0x2027   :  { %1432 = vrcp.f32 %v1169_v44 }
0x2034   :  { %v1433_v6 = vpop.eup %1432 }
0x2035   :  { %v1176_v48 = vmul.f32 %v1433_v6, %v1174_v47 }
0x2095   :  { %v1179_v45 = vpop.permute.xlu0 %1178 }
0x2096   :  { %v1181_v46 = vmul.f32 %v1433_v6, %v1179_v45 }
0x2098   :  { %1183 = vrot.lane.b32.xlu1 %v1181_v46, %s1515_s1 }
0x210a   :  { %v1184_v50 = vpop.permute.xlu1 %1183 }
0x210b   :  { %v1186_v51 = vadd.f32 %v1184_v50, %v1176_v48 }
0x210d   :  { %1434 = vtanh.f32 %v1186_v51 }
0x211a   :  { %v1435_v7 = vpop.eup %1434 }
0x211b   :  { %1189 = vrot.lane.b32.xlu1 %v1435_v7, %s1514_s0 }
0x218d   :  { %v1190_v52 = vpop.permute.xlu1 %1189 }
0x218e   :  { %v1192_v54 = vmul.f32 %v1433_v6, %v1190_v52 }
0x2190   :  { %v1194_v55 = vrot.slane %v1192_v54, 7 }
0x2192   :  { %1195 = vrot.lane.b32.xlu0 %v1194_v55, %s1515_s1 }
0x2204   :  { %v1196_v56 = vpop.permute.xlu0 %1195 }
0x2205   :  { %1351 = vmatmul.mubr.msk.f32.vlgmr.msra.gmra.mxu0 %vm159_vm2, %v1196_v56  ;;  %vm679_vm2 = vcmp.eq.s32.totalorder %v1614_v49, 3 }
0x2206   :  { %v684_v15 = vsel %vm679_vm2, %v683_v60, %v536_v1 }
0x2207   :  { %v832_v12 = vsel %vm827_vm13, %v831_v35, %v684_v15 }
0x2208   :  { %v980_v17 = vsel %vm975_vm14, %v979_v31, %v832_v12 }
0x2209   :  { %v1128_v5 = vsel %vm1123_vm15, %v1127_v29, %v980_v17 }
0x22c5   :  { %v1265_v62 = vpop.f32.mrf.mxu0 }
0x22c7   :  { %v1266_v2 = vpop.f32.mrf.mxu0 }
0x22c8   :  { %v1269_v3 = vadd.f32 %v1266_v2, %v1602_v33 }
0x22ca   :  { %v1274_v4 = vrot.slane %v1269_v3, %v1617_v53 }
0x22cc   :  { %v1275_v11 = vsel %vm1270_vm0, %v1274_v4, %v1128_v5 }
0x22cd   :  { %v1277_v13 = vsel %vm1276_vm1, %v1275_v11, -inf }
0x22ce   :  { %1278 = vmax.xlane.f32.xlu1 %v1277_v13 }
0x2357   :  { %v1279_v9 = vpop.xlane.xlu1 %1278 }
0x2358   :  { %v1280_v14 = vsub.f32 %v1275_v11, %v1279_v9  ;;  %vm1286_vm4 = vcmp.eq.f32.partialorder %v1275_v11, %v1279_v9 }
0x2359   :  { %v1287_v16 = vsel %vm1286_vm4, %v1609_v38, 8 }
0x235a   :  { %v1281_v33 = vmul.f32 1.442695, %v1280_v14  ;;  %v1288_v8 = vsel %vm1276_vm1, %v1287_v16, 2147483647 }
0x235b   :  { %v1290_v10 = vshra.s32 %v1288_v8, 16  ;;  %v1289_v21 = vand.u32 65535, %v1288_v8 }
0x235c   :  { %1436 = vpow2.f32 %v1281_v33 }
0x235d   :  { %v1292_v49 = vcvt.s32.f32 %v1290_v10  ;;  %v1291_v23 = vcvt.s32.f32 %v1289_v21 }
0x235f   :  { %1293 = vmin.xlane.f32.xlu0 %v1292_v49 }
0x2369   :  { %v1437_v53 = vpop.eup %1436 }
0x236a   :  { %v1283_v0 = vsel %vm1276_vm1, %v1437_v53, 0.0 }
0x236b   :  { %1284 = vadd.xlane.f32.xlu0 %v1283_v0 }
0x23e8   :  { %v1294_v22 = vpop.xlane.xlu0 %1293 }
0x23e9   :  { %vm1295_vm5 = vcmp.eq.f32.partialorder %v1292_v49, %v1294_v22  ;;  %v1300_v19 = vcvt.f32.s32 %v1294_v22 }
0x23ea   :  { %v1296_v24 = vsel %vm1295_vm5, %v1291_v23, inf }
0x23eb   :  { %1297 = vmin.xlane.f32.xlu1 %v1296_v24  ;;  %v1301_v32 = vshll.u32 %v1300_v19, 16 }
0x23f4   :  { %v1285_v25 = vpop.xlane.xlu0 %1284 }
0x23f5   :  { %1438 = vlog2.f32 %v1285_v25 }
0x23f6   :  { %1440 = vrcp.f32 %v1285_v25 }
0x2402   :  { %v1439_v38 = vpop.eup %1438 }
0x2403   :  { %v1441_v26 = vpop.eup %1440  ;;  %v1306_v27 = vmul.f32 0.6931472, %v1439_v38 }
0x2404   :  { %v1310_v18 = vmul.f32 %v1441_v26, %v1437_v53 }
0x2405   :  { %v1307_v28 = vsub.f32 %v1280_v14, %v1306_v27 }
0x2406   :  { %1312 = vrot.lane.b32.xlu0 %v1310_v18, %s1516_s21 }
0x2407   :  { %1308 = vst.msk [vmem:[#allocation7] sm:$0xff] %vm1276_vm1, %v1307_v28 }
0x2474   :  { %v1298_v30 = vpop.xlane.xlu1 %1297 }
0x2475   :  { %v1299_v34 = vcvt.f32.s32 %v1298_v30 }
0x2477   :  { %v1302_v36 = vadd.s32 %v1301_v32, %v1299_v34 }
0x2478   :  { %v1313_v20 = vpop.permute.xlu0 %1312 }
0x2479   :  { %v1303_v37 = vcvt.s32.f32 %v1302_v36  ;;  %1316 = vst.msk [vmem:[#allocation7] sm:$0xff] %vm1315_vm6, %v1313_v20 }
0x247b   :  { %1318 = vst.msk [vmem:[#allocation7] sm:$0xff] %vm1317_vm7, %v1303_v37 }
0x247c   :  { %1493 = shalt.err (!%p1490_p0)
}
0x247d   :  { %1328 = dma.vmem_to_hbm [thread:$0]  %s1326_s23, 128, %s1828_s2, [#allocation4]  }
0x247e   :  { %1506 = dma.done.wait [#allocation4], 128  }
0x247f   :  { %1507 = vsyncadd [#allocation4], 4294967168 }
0x2480   :  { %1332 = vsyncpa [#allocation3], 1 }
0x2481   :  { %1333 = vsyncpa [#allocation6], 1 }
0x2482   :  { %1334 = vsyncpa [#allocation4], 1 }

</bundles_post_ra>
